<compile_context>
chip_gen: v7x
topology: tpu7x:2x2x1
jax: 0.10.0
libtpu: 0.0.40
codegen_flags: <defaults>
</compile_context>

<pallas_src>
import functools

import jax
import jax.numpy as jnp
from jax import lax
from jax.experimental import pallas as pl
from jax.experimental.pallas import tpu as pltpu

EPS = 1e-5


def _res_block_kernel(x_ref, w1_ref, w23_ref, wid_ref, b_ref, ln_ref,
                      seg_ref, segt_ref, o_ref, patch_ref, *,
                      kernel_size, pad, seq_len, c_pad, compute_dtype):
    n = x_ref.shape[-1]                    # folded lanes per block: TB * seq_len
    seg = seg_ref[...]                     # (n, TB)  0/1 per-sample reduce matrix
    segt = segt_ref[...]                   # (TB, n)  broadcast-back * 1/(Cout*L)

    # Zero the patch scratch once per step so never-written pad rows are 0.0
    # (their weight columns are 0 too, but 0 * uninitialized-NaN would still
    # poison the MXU accumulation).
    patch_ref[...] = jnp.zeros(patch_ref.shape, patch_ref.dtype)

    def conv(h, w_2d, bias):
        # h: (C, n) f32 -> (Cout, n) f32 via a single im2col matmul.
        c = h.shape[0]
        lpos = lax.broadcasted_iota(jnp.int32, h.shape, 1) % seq_len
        for t in range(kernel_size):       # K is small & static -> unrolled
            s = pad - t                    # static lane shift for this tap
            if s == 0:
                slab = h
            else:
                rolled = pltpu.roll(h, s % n, 1)          # XLU lane rotate
                valid = (lpos >= s) & (lpos < seq_len + s)
                slab = jnp.where(valid, rolled, 0.0)      # halo zeros at edges
            patch_ref[t * c_pad:t * c_pad + c, :] = slab  # 8-aligned row offset
        patches = patch_ref[...].astype(compute_dtype)    # (K*c_pad, n)
        acc = jnp.dot(w_2d, patches, preferred_element_type=jnp.float32)
        return acc + bias                  # (Cout, 1) broadcast bias add

    def layernorm(y, gamma, beta):
        # Per-sample LayerNorm over (Cout, seq_len) segments of the folded
        # (Cout, n) slab.  Single-pass stats; segment reduce + broadcast-back
        # done as tiny MXU matmuls (segt already carries 1/(Cout*seq_len)).
        s1 = jnp.sum(y, axis=0, keepdims=True)            # (1, n)
        s2 = jnp.sum(y * y, axis=0, keepdims=True)        # (1, n)
        mean = jnp.dot(jnp.dot(s1, seg, preferred_element_type=jnp.float32),
                       segt, preferred_element_type=jnp.float32)   # (1, n)
        msq = jnp.dot(jnp.dot(s2, seg, preferred_element_type=jnp.float32),
                      segt, preferred_element_type=jnp.float32)    # (1, n)
        var = msq - mean * mean                           # biased variance
        return (y - mean) * lax.rsqrt(var + EPS) * gamma + beta

    x = x_ref[...].astype(jnp.float32)     # (Cin, n)

    # main branch: (conv -> LN -> ReLU) x 3
    h = conv(x, w1_ref[...], b_ref[0])
    h = jnp.maximum(layernorm(h, ln_ref[0], ln_ref[1]), 0.0)
    h = conv(h, w23_ref[0], b_ref[1])
    h = jnp.maximum(layernorm(h, ln_ref[2], ln_ref[3]), 0.0)
    h = conv(h, w23_ref[1], b_ref[2])
    h = jnp.maximum(layernorm(h, ln_ref[4], ln_ref[5]), 0.0)

    # identity branch: 1x1 conv == plain channel matmul -> LN
    ident = jnp.dot(wid_ref[...], x.astype(compute_dtype),
                    preferred_element_type=jnp.float32) + b_ref[3]
    ident = layernorm(ident, ln_ref[6], ln_ref[7])

    o_ref[...] = jnp.maximum(ident + h, 0.0)


def _choose_batch_tile(batch, seq_len, max_lanes=2048):
    """Largest batch tile TB with TB*seq_len a multiple of 128 (or TB == batch),
    preferring >= 2 grid steps so v7x can shard across both TensorCores."""
    cands = []
    for tb in range(1, batch + 1):
        if batch % tb:
            continue
        lanes = tb * seq_len
        if lanes > max_lanes and tb != 1:
            continue
        if lanes % 128 != 0 and tb != batch:
            continue                       # keep the lane block (8,128)-friendly
        cands.append(tb)
    multi = [tb for tb in cands if batch // tb >= 2]
    pool = multi or cands or [batch]
    return max(pool)


def classifier_res_block(x, params, kernel_size, pad, *,
                         compute_dtype=jnp.bfloat16, batch_tile=None):
    """x: (B, Cin, L) f32 -> (B, Cout, L) f32.  Weights in PyTorch Conv1d layout."""
    B, Cin, L = x.shape
    Cout = params["w1"].shape[0]
    TB = batch_tile if batch_tile is not None else _choose_batch_tile(B, L)
    assert B % TB == 0, "batch must be divisible by the batch tile"
    N = TB * L                                   # lanes per grid step
    c_pad = -(-max(Cin, Cout) // 8) * 8          # channels rounded to sublane tile

    # ---- host-side layout plumbing: lane-dense activations, packed params ----
    x_f = jnp.transpose(x, (1, 0, 2)).reshape(Cin, B * L)

    def pack_w(w):                               # (Cout, C, K) -> (Cout, K*c_pad)
        co, c, _ = w.shape
        wt = jnp.transpose(w, (0, 2, 1))         # (Cout, K, C), t-major columns
        wt = jnp.pad(wt, ((0, 0), (0, 0), (0, c_pad - c)))
        return wt.reshape(co, -1)

    w1p = pack_w(params["w1"]).astype(compute_dtype)
    w23p = jnp.stack([pack_w(params["w2"]),
                      pack_w(params["w3"])]).astype(compute_dtype)
    widp = params["wid"].reshape(Cout, Cin).astype(compute_dtype)
    bias = jnp.stack([params["b1"], params["b2"], params["b3"],
                      params["bid"]]).reshape(4, Cout, 1).astype(jnp.float32)
    ln = jnp.stack([params["g1"], params["be1"], params["g2"], params["be2"],
                    params["g3"], params["be3"], params["gid"], params["beid"]])
    ln = jnp.tile(ln, (1, 1, TB)).astype(jnp.float32)            # (8, Cout, N)
    sample_id = jnp.arange(N, dtype=jnp.int32) // L
    seg = (sample_id[:, None] ==
           jnp.arange(TB, dtype=jnp.int32)[None, :]).astype(jnp.float32)  # (N, TB)
    segt = jnp.transpose(seg) / float(Cout * L)                  # (TB, N) + 1/cnt

    def const_spec(a):                           # grid-invariant, full-block param
        nd = a.ndim
        return pl.BlockSpec(a.shape, lambda i, _nd=nd: (0,) * _nd)

    kernel = functools.partial(_res_block_kernel, kernel_size=kernel_size,
                               pad=pad, seq_len=L, c_pad=c_pad,
                               compute_dtype=compute_dtype)

    out_f = pl.pallas_call(
        kernel,
        out_shape=jax.ShapeDtypeStruct((Cout, B * L), jnp.float32),
        grid_spec=pltpu.PrefetchScalarGridSpec(
            num_scalar_prefetch=0,
            grid=(B // TB,),
            in_specs=[pl.BlockSpec((Cin, N), lambda i: (0, i)),
                      const_spec(w1p), const_spec(w23p), const_spec(widp),
                      const_spec(bias), const_spec(ln),
                      const_spec(seg), const_spec(segt)],
            out_specs=pl.BlockSpec((Cout, N), lambda i: (0, i)),
            scratch_shapes=[pltpu.VMEM((kernel_size * c_pad, N), jnp.float32)],
        ),
        compiler_params=pltpu.CompilerParams(
            dimension_semantics=("parallel",),
            # Toy sizes fit easily.  For large Cout*L: raise further (v5e/v6e),
            # and on v7x (64 MiB VMEM) tile L / single-buffer the invariant params.
            vmem_limit_bytes=32 * 1024 * 1024),
    )(x_f, w1p, w23p, widp, bias, ln, seg, segt)

    return jnp.transpose(out_f.reshape(Cout, B, L), (1, 0, 2))


# ---------------- pure-JAX reference (correctness check) ----------------
def ref_forward(x, p, pad):
    def conv1d(xx, w, b):
        y = lax.conv_general_dilated(xx, w, window_strides=(1,),
                                     padding=[(pad, pad)],
                                     dimension_numbers=("NCH", "OIH", "NCH"))
        return y + b[None, :, None]

    def ln(y, g, be):
        mean = y.mean(axis=(1, 2), keepdims=True)
        var = ((y - mean) ** 2).mean(axis=(1, 2), keepdims=True)
        return (y - mean) / jnp.sqrt(var + EPS) * g[None] + be[None]

    h = jax.nn.relu(ln(conv1d(x, p["w1"], p["b1"]), p["g1"], p["be1"]))
    h = jax.nn.relu(ln(conv1d(h, p["w2"], p["b2"]), p["g2"], p["be2"]))
    h = jax.nn.relu(ln(conv1d(h, p["w3"], p["b3"]), p["g3"], p["be3"]))
    ident = lax.conv_general_dilated(x, p["wid"], window_strides=(1,),
                                     padding=[(0, 0)],
                                     dimension_numbers=("NCH", "OIH", "NCH"))
    ident = ident + p["bid"][None, :, None]
    ident = ln(ident, p["gid"], p["beid"])
    return jax.nn.relu(ident + h)


def init_params(key, in_channels, out_channels, kernel_size, seq_len):
    keys = jax.random.split(key, 12)
    p = {}
    p["w1"] = 0.2 * jax.random.normal(keys[0], (out_channels, in_channels, kernel_size), jnp.float32)
    p["b1"] = 0.1 * jax.random.normal(keys[1], (out_channels,), jnp.float32)
    p["w2"] = 0.2 * jax.random.normal(keys[2], (out_channels, out_channels, kernel_size), jnp.float32)
    p["b2"] = 0.1 * jax.random.normal(keys[3], (out_channels,), jnp.float32)
    p["w3"] = 0.2 * jax.random.normal(keys[4], (out_channels, out_channels, kernel_size), jnp.float32)
    p["b3"] = 0.1 * jax.random.normal(keys[5], (out_channels,), jnp.float32)
    p["wid"] = 0.2 * jax.random.normal(keys[6], (out_channels, in_channels, 1), jnp.float32)
    p["bid"] = 0.1 * jax.random.normal(keys[7], (out_channels,), jnp.float32)
    # LayerNorm affine params (elementwise over (C, L)); non-trivial values
    p["g1"] = 1.0 + 0.05 * jax.random.normal(keys[8], (out_channels, seq_len), jnp.float32)
    p["be1"] = 0.05 * jax.random.normal(keys[9], (out_channels, seq_len), jnp.float32)
    p["g2"] = 1.0 + 0.05 * jax.random.normal(keys[10], (out_channels, seq_len), jnp.float32)
    p["be2"] = 0.05 * jax.random.normal(keys[11], (out_channels, seq_len), jnp.float32)
    k2 = jax.random.split(keys[11], 4)
    p["g3"] = 1.0 + 0.05 * jax.random.normal(k2[0], (out_channels, seq_len), jnp.float32)
    p["be3"] = 0.05 * jax.random.normal(k2[1], (out_channels, seq_len), jnp.float32)
    p["gid"] = 1.0 + 0.05 * jax.random.normal(k2[2], (out_channels, seq_len), jnp.float32)
    p["beid"] = 0.05 * jax.random.normal(k2[3], (out_channels, seq_len), jnp.float32)
    return p


if __name__ == "__main__":
    B, Cin, Cout, L = 16, 4, 8, 16
    K, PAD = 3, 1   # 'same' padding so LayerNorm((Cout, L)) matches conv length

    key = jax.random.PRNGKey(0)
    kx, kp = jax.random.split(key)
    x = jax.random.normal(kx, (B, Cin, L), jnp.float32)
    params = init_params(kp, Cin, Cout, K, L)

    ref = ref_forward(x, params, PAD)

    # Exact-correctness gate: f32 matmul path vs pure-JAX reference.
    out_f32 = jax.block_until_ready(
        classifier_res_block(x, params, K, PAD, compute_dtype=jnp.float32))
    assert out_f32.shape == (B, Cout, L)
    assert jnp.allclose(out_f32, ref, atol=1e-4, rtol=1e-4), \
        f"f32 max abs diff = {jnp.max(jnp.abs(out_f32 - ref))}"

    # Fast path: bf16 matmul inputs with f32 accumulation (relaxed tolerance).
    out_bf16 = jax.block_until_ready(
        classifier_res_block(x, params, K, PAD, compute_dtype=jnp.bfloat16))
    assert jnp.allclose(out_bf16, ref, atol=1e-1, rtol=1e-1), \
        f"bf16 max abs diff = {jnp.max(jnp.abs(out_bf16 - ref))}"

    print("KERNEL_OK")
</pallas_src>

<mosaic_0001>
module attributes {stable_mosaic.version = 11 : i64} {
  func.func @_res_block_kernel(%arg0: i32, %arg1: memref<4x128xf32, #tpu.memory_space<vmem>>, %arg2: memref<8x24xf32, #tpu.memory_space<vmem>>, %arg3: memref<2x8x24xf32, #tpu.memory_space<vmem>>, %arg4: memref<8x4xf32, #tpu.memory_space<vmem>>, %arg5: memref<4x8x1xf32, #tpu.memory_space<vmem>>, %arg6: memref<8x8x128xf32, #tpu.memory_space<vmem>>, %arg7: memref<128x8xf32, #tpu.memory_space<vmem>>, %arg8: memref<8x128xf32, #tpu.memory_space<vmem>>, %arg9: memref<8x128xf32, #tpu.memory_space<vmem>>, %arg10: memref<24x128xf32, #tpu.memory_space<vmem>>) attributes {dimension_semantics = [#tpu.dimension_semantics<parallel>], iteration_bounds = array<i64: 2>, scalar_prefetch = 0 : i64, scratch_operands = 1 : i64, tpu.core_type = #tpu.core_type<tc>, window_params = [{transform_indices = @transform_0, window_bounds = array<i64: 4, 128>}, {pipeline_mode = #tpu.pipeline_mode<synchronous>, transform_indices = @transform_1, window_bounds = array<i64: 8, 24>}, {pipeline_mode = #tpu.pipeline_mode<synchronous>, transform_indices = @transform_2, window_bounds = array<i64: 2, 8, 24>}, {pipeline_mode = #tpu.pipeline_mode<synchronous>, transform_indices = @transform_3, window_bounds = array<i64: 8, 4>}, {pipeline_mode = #tpu.pipeline_mode<synchronous>, transform_indices = @transform_4, window_bounds = array<i64: 4, 8, 1>}, {pipeline_mode = #tpu.pipeline_mode<synchronous>, transform_indices = @transform_5, window_bounds = array<i64: 8, 8, 128>}, {pipeline_mode = #tpu.pipeline_mode<synchronous>, transform_indices = @transform_6, window_bounds = array<i64: 128, 8>}, {pipeline_mode = #tpu.pipeline_mode<synchronous>, transform_indices = @transform_7, window_bounds = array<i64: 8, 128>}, {transform_indices = @transform_8, window_bounds = array<i64: 8, 128>}]} {
    %c0 = arith.constant 0 : index
    %c0_0 = arith.constant 0 : index
    %0 = vector.load %arg7[%c0, %c0_0] : memref<128x8xf32, #tpu.memory_space<vmem>>, vector<128x8xf32>
    %c0_1 = arith.constant 0 : index
    %c0_2 = arith.constant 0 : index
    %1 = vector.load %arg8[%c0_1, %c0_2] : memref<8x128xf32, #tpu.memory_space<vmem>>, vector<8x128xf32>
    %cst = arith.constant 0.000000e+00 : f32
    %2 = vector.broadcast %cst : f32 to vector<24x128xf32>
    %c0_3 = arith.constant 0 : index
    %c0_4 = arith.constant 0 : index
    %3 = vector.load %arg10[%c0_3, %c0_4] : memref<24x128xf32, #tpu.memory_space<vmem>>, vector<24x128xf32>
    tpu.vector_store %arg10[%c0_3, %c0_4], %2 {strides = array<i32>} : memref<24x128xf32, #tpu.memory_space<vmem>>, vector<24x128xf32>,
    %c0_5 = arith.constant 0 : index
    %c0_6 = arith.constant 0 : index
    %4 = vector.load %arg1[%c0_5, %c0_6] : memref<4x128xf32, #tpu.memory_space<vmem>>, vector<4x128xf32>
    %c0_7 = arith.constant 0 : index
    %c0_8 = arith.constant 0 : index
    %5 = vector.load %arg2[%c0_7, %c0_8] : memref<8x24xf32, #tpu.memory_space<vmem>>, vector<8x24xf32>
    %c0_9 = arith.constant 0 : index
    %c0_10 = arith.constant 0 : index
    %c0_11 = arith.constant 0 : index
    %6 = vector.load %arg5[%c0_9, %c0_10, %c0_11] : memref<4x8x1xf32, #tpu.memory_space<vmem>>, vector<1x8x1xf32>
    %7 = vector.shape_cast %6 : vector<1x8x1xf32> to vector<8x1xf32>
    %8 = tpu.iota {dimensions = array<i32: 1>} : vector<4x128xi32>
    %c16_i32 = arith.constant 16 : i32
    %c0_i32 = arith.constant 0 : i32
    %9 = arith.cmpi eq, %c16_i32, %c0_i32 : i32
    %c1_i32 = arith.constant 1 : i32
    %10 = arith.select %9, %c1_i32, %c16_i32 : i32
    %11 = vector.broadcast %10 : i32 to vector<4x128xi32>
    %12 = arith.remsi %8, %11 : vector<4x128xi32>
    %c0_i32_12 = arith.constant 0 : i32
    %13 = vector.broadcast %c0_i32_12 : i32 to vector<4x128xi32>
    %14 = arith.cmpi ne, %12, %13 : vector<4x128xi32>
    %c0_i32_13 = arith.constant 0 : i32
    %15 = vector.broadcast %c0_i32_13 : i32 to vector<4x128xi32>
    %16 = arith.cmpi slt, %12, %15 : vector<4x128xi32>
    %c0_i32_14 = arith.constant 0 : i32
    %17 = arith.cmpi slt, %10, %c0_i32_14 : i32
    %18 = vector.broadcast %17 : i1 to vector<4x128xi1>
    %19 = vector.broadcast %18 : vector<4x128xi1> to vector<4x128xi1>
    %20 = arith.xori %16, %19 : vector<4x128xi1>
    %21 = arith.andi %20, %14 : vector<4x128xi1>
    %22 = vector.broadcast %10 : i32 to vector<4x128xi32>
    %23 = arith.addi %12, %22 : vector<4x128xi32>
    %24 = arith.select %21, %23, %12 : vector<4x128xi1>, vector<4x128xi32>
    %c1_i32_15 = arith.constant 1 : i32
    %25 = tpu.dynamic_rotate %4 by %c1_i32_15 dim 1 : vector<4x128xf32>, i32 -> vector<4x128xf32>
    %c1_i32_16 = arith.constant 1 : i32
    %26 = vector.broadcast %c1_i32_16 : i32 to vector<4x128xi32>
    %27 = arith.cmpi sge, %24, %26 : vector<4x128xi32>
    %c17_i32 = arith.constant 17 : i32
    %28 = vector.broadcast %c17_i32 : i32 to vector<4x128xi32>
    %29 = arith.cmpi slt, %24, %28 : vector<4x128xi32>
    %30 = arith.andi %27, %29 : vector<4x128xi1>
    %cst_17 = arith.constant 0.000000e+00 : f32
    %31 = vector.broadcast %cst_17 : f32 to vector<4x128xf32>
    %32 = arith.select %30, %25, %31 : vector<4x128xi1>, vector<4x128xf32>
    %c0_18 = arith.constant 0 : index
    %c0_19 = arith.constant 0 : index
    %33 = vector.load %arg10[%c0_18, %c0_19] : memref<24x128xf32, #tpu.memory_space<vmem>>, vector<4x128xf32>
    tpu.vector_store %arg10[%c0_18, %c0_19], %32 {strides = array<i32>} : memref<24x128xf32, #tpu.memory_space<vmem>>, vector<4x128xf32>,
    %c8 = arith.constant 8 : index
    %c0_20 = arith.constant 0 : index
    %34 = vector.load %arg10[%c8, %c0_20] : memref<24x128xf32, #tpu.memory_space<vmem>>, vector<4x128xf32>
    tpu.vector_store %arg10[%c8, %c0_20], %4 {strides = array<i32>} : memref<24x128xf32, #tpu.memory_space<vmem>>, vector<4x128xf32>,
    %c127_i32 = arith.constant 127 : i32
    %35 = tpu.dynamic_rotate %4 by %c127_i32 dim 1 : vector<4x128xf32>, i32 -> vector<4x128xf32>
    %c-1_i32 = arith.constant -1 : i32
    %36 = vector.broadcast %c-1_i32 : i32 to vector<4x128xi32>
    %37 = arith.cmpi sge, %24, %36 : vector<4x128xi32>
    %c15_i32 = arith.constant 15 : i32
    %38 = vector.broadcast %c15_i32 : i32 to vector<4x128xi32>
    %39 = arith.cmpi slt, %24, %38 : vector<4x128xi32>
    %40 = arith.andi %37, %39 : vector<4x128xi1>
    %cst_21 = arith.constant 0.000000e+00 : f32
    %41 = vector.broadcast %cst_21 : f32 to vector<4x128xf32>
    %42 = arith.select %40, %35, %41 : vector<4x128xi1>, vector<4x128xf32>
    %c16 = arith.constant 16 : index
    %c0_22 = arith.constant 0 : index
    %43 = vector.load %arg10[%c16, %c0_22] : memref<24x128xf32, #tpu.memory_space<vmem>>, vector<4x128xf32>
    tpu.vector_store %arg10[%c16, %c0_22], %42 {strides = array<i32>} : memref<24x128xf32, #tpu.memory_space<vmem>>, vector<4x128xf32>,
    %c0_23 = arith.constant 0 : index
    %c0_24 = arith.constant 0 : index
    %44 = vector.load %arg10[%c0_23, %c0_24] : memref<24x128xf32, #tpu.memory_space<vmem>>, vector<24x128xf32>
    %cst_25 = arith.constant dense<0.000000e+00> : vector<8x128xf32>
    %45 = tpu.matmul %5, %44, %cst_25 {dimension_numbers = #tpu.dot_dimension_numbers<[1], [0], [0], [1], [0, 0, 1, 1], [], []>} : vector<8x24xf32>, vector<24x128xf32>, vector<8x128xf32> -> vector<8x128xf32>
    %46 = vector.broadcast %7 : vector<8x1xf32> to vector<8x128xf32>
    %47 = arith.addf %45, %46 : vector<8x128xf32>
    %c0_26 = arith.constant 0 : index
    %c0_27 = arith.constant 0 : index
    %c0_28 = arith.constant 0 : index
    %48 = vector.load %arg6[%c0_26, %c0_27, %c0_28] : memref<8x8x128xf32, #tpu.memory_space<vmem>>, vector<1x8x128xf32>
    %49 = vector.shape_cast %48 : vector<1x8x128xf32> to vector<8x128xf32>
    %c1 = arith.constant 1 : index
    %c0_29 = arith.constant 0 : index
    %c0_30 = arith.constant 0 : index
    %50 = vector.load %arg6[%c1, %c0_29, %c0_30] : memref<8x8x128xf32, #tpu.memory_space<vmem>>, vector<1x8x128xf32>
    %51 = vector.shape_cast %50 : vector<1x8x128xf32> to vector<8x128xf32>
    %cst_31 = arith.constant dense<0.000000e+00> : vector<128xf32>
    %52 = vector.multi_reduction <add>, %47, %cst_31 [0] : vector<8x128xf32> to vector<128xf32>
    %53 = vector.shape_cast %52 : vector<128xf32> to vector<1x128xf32>
    %54 = arith.mulf %47, %47 : vector<8x128xf32>
    %cst_32 = arith.constant dense<0.000000e+00> : vector<128xf32>
    %55 = vector.multi_reduction <add>, %54, %cst_32 [0] : vector<8x128xf32> to vector<128xf32>
    %56 = vector.shape_cast %55 : vector<128xf32> to vector<1x128xf32>
    %cst_33 = arith.constant dense<0.000000e+00> : vector<1x8xf32>
    %57 = tpu.matmul %53, %0, %cst_33 {dimension_numbers = #tpu.dot_dimension_numbers<[1], [0], [0], [1], [0, 0, 1, 1], [], []>} : vector<1x128xf32>, vector<128x8xf32>, vector<1x8xf32> -> vector<1x8xf32>
    %cst_34 = arith.constant dense<0.000000e+00> : vector<1x128xf32>
    %58 = tpu.matmul %57, %1, %cst_34 {dimension_numbers = #tpu.dot_dimension_numbers<[1], [0], [0], [1], [0, 0, 1, 1], [], []>} : vector<1x8xf32>, vector<8x128xf32>, vector<1x128xf32> -> vector<1x128xf32>
    %cst_35 = arith.constant dense<0.000000e+00> : vector<1x8xf32>
    %59 = tpu.matmul %56, %0, %cst_35 {dimension_numbers = #tpu.dot_dimension_numbers<[1], [0], [0], [1], [0, 0, 1, 1], [], []>} : vector<1x128xf32>, vector<128x8xf32>, vector<1x8xf32> -> vector<1x8xf32>
    %cst_36 = arith.constant dense<0.000000e+00> : vector<1x128xf32>
    %60 = tpu.matmul %59, %1, %cst_36 {dimension_numbers = #tpu.dot_dimension_numbers<[1], [0], [0], [1], [0, 0, 1, 1], [], []>} : vector<1x8xf32>, vector<8x128xf32>, vector<1x128xf32> -> vector<1x128xf32>
    %61 = arith.mulf %58, %58 : vector<1x128xf32>
    %62 = arith.subf %60, %61 : vector<1x128xf32>
    %63 = vector.broadcast %58 : vector<1x128xf32> to vector<8x128xf32>
    %64 = arith.subf %47, %63 : vector<8x128xf32>
    %cst_37 = arith.constant 9.99999974E-6 : f32
    %65 = vector.broadcast %cst_37 : f32 to vector<1x128xf32>
    %66 = arith.addf %62, %65 : vector<1x128xf32>
    %67 = math.rsqrt %66 : vector<1x128xf32>
    %68 = vector.broadcast %67 : vector<1x128xf32> to vector<8x128xf32>
    %69 = arith.mulf %64, %68 : vector<8x128xf32>
    %70 = arith.mulf %69, %49 : vector<8x128xf32>
    %71 = arith.addf %70, %51 : vector<8x128xf32>
    %cst_38 = arith.constant 0.000000e+00 : f32
    %72 = vector.broadcast %cst_38 : f32 to vector<8x128xf32>
    %73 = arith.maximumf %71, %72 : vector<8x128xf32>
    %c0_39 = arith.constant 0 : index
    %c0_40 = arith.constant 0 : index
    %c0_41 = arith.constant 0 : index
    %74 = vector.load %arg3[%c0_39, %c0_40, %c0_41] : memref<2x8x24xf32, #tpu.memory_space<vmem>>, vector<1x8x24xf32>
    %75 = vector.shape_cast %74 : vector<1x8x24xf32> to vector<8x24xf32>
    %c1_42 = arith.constant 1 : index
    %c0_43 = arith.constant 0 : index
    %c0_44 = arith.constant 0 : index
    %76 = vector.load %arg5[%c1_42, %c0_43, %c0_44] : memref<4x8x1xf32, #tpu.memory_space<vmem>>, vector<1x8x1xf32>
    %77 = vector.shape_cast %76 : vector<1x8x1xf32> to vector<8x1xf32>
    %78 = tpu.iota {dimensions = array<i32: 1>} : vector<8x128xi32>
    %c16_i32_45 = arith.constant 16 : i32
    %c0_i32_46 = arith.constant 0 : i32
    %79 = arith.cmpi eq, %c16_i32_45, %c0_i32_46 : i32
    %c1_i32_47 = arith.constant 1 : i32
    %80 = arith.select %79, %c1_i32_47, %c16_i32_45 : i32
    %81 = vector.broadcast %80 : i32 to vector<8x128xi32>
    %82 = arith.remsi %78, %81 : vector<8x128xi32>
    %c0_i32_48 = arith.constant 0 : i32
    %83 = vector.broadcast %c0_i32_48 : i32 to vector<8x128xi32>
    %84 = arith.cmpi ne, %82, %83 : vector<8x128xi32>
    %c0_i32_49 = arith.constant 0 : i32
    %85 = vector.broadcast %c0_i32_49 : i32 to vector<8x128xi32>
    %86 = arith.cmpi slt, %82, %85 : vector<8x128xi32>
    %c0_i32_50 = arith.constant 0 : i32
    %87 = arith.cmpi slt, %80, %c0_i32_50 : i32
    %88 = vector.broadcast %87 : i1 to vector<8x128xi1>
    %89 = vector.broadcast %88 : vector<8x128xi1> to vector<8x128xi1>
    %90 = arith.xori %86, %89 : vector<8x128xi1>
    %91 = arith.andi %90, %84 : vector<8x128xi1>
    %92 = vector.broadcast %80 : i32 to vector<8x128xi32>
    %93 = arith.addi %82, %92 : vector<8x128xi32>
    %94 = arith.select %91, %93, %82 : vector<8x128xi1>, vector<8x128xi32>
    %c1_i32_51 = arith.constant 1 : i32
    %95 = tpu.dynamic_rotate %73 by %c1_i32_51 dim 1 : vector<8x128xf32>, i32 -> vector<8x128xf32>
    %c1_i32_52 = arith.constant 1 : i32
    %96 = vector.broadcast %c1_i32_52 : i32 to vector<8x128xi32>
    %97 = arith.cmpi sge, %94, %96 : vector<8x128xi32>
    %c17_i32_53 = arith.constant 17 : i32
    %98 = vector.broadcast %c17_i32_53 : i32 to vector<8x128xi32>
    %99 = arith.cmpi slt, %94, %98 : vector<8x128xi32>
    %100 = arith.andi %97, %99 : vector<8x128xi1>
    %cst_54 = arith.constant 0.000000e+00 : f32
    %101 = vector.broadcast %cst_54 : f32 to vector<8x128xf32>
    %102 = arith.select %100, %95, %101 : vector<8x128xi1>, vector<8x128xf32>
    %c0_55 = arith.constant 0 : index
    %c0_56 = arith.constant 0 : index
    %103 = vector.load %arg10[%c0_55, %c0_56] : memref<24x128xf32, #tpu.memory_space<vmem>>, vector<8x128xf32>
    tpu.vector_store %arg10[%c0_55, %c0_56], %102 {strides = array<i32>} : memref<24x128xf32, #tpu.memory_space<vmem>>, vector<8x128xf32>,
    %c8_57 = arith.constant 8 : index
    %c0_58 = arith.constant 0 : index
    %104 = vector.load %arg10[%c8_57, %c0_58] : memref<24x128xf32, #tpu.memory_space<vmem>>, vector<8x128xf32>
    tpu.vector_store %arg10[%c8_57, %c0_58], %73 {strides = array<i32>} : memref<24x128xf32, #tpu.memory_space<vmem>>, vector<8x128xf32>,
    %c127_i32_59 = arith.constant 127 : i32
    %105 = tpu.dynamic_rotate %73 by %c127_i32_59 dim 1 : vector<8x128xf32>, i32 -> vector<8x128xf32>
    %c-1_i32_60 = arith.constant -1 : i32
    %106 = vector.broadcast %c-1_i32_60 : i32 to vector<8x128xi32>
    %107 = arith.cmpi sge, %94, %106 : vector<8x128xi32>
    %c15_i32_61 = arith.constant 15 : i32
    %108 = vector.broadcast %c15_i32_61 : i32 to vector<8x128xi32>
    %109 = arith.cmpi slt, %94, %108 : vector<8x128xi32>
    %110 = arith.andi %107, %109 : vector<8x128xi1>
    %cst_62 = arith.constant 0.000000e+00 : f32
    %111 = vector.broadcast %cst_62 : f32 to vector<8x128xf32>
    %112 = arith.select %110, %105, %111 : vector<8x128xi1>, vector<8x128xf32>
    %c16_63 = arith.constant 16 : index
    %c0_64 = arith.constant 0 : index
    %113 = vector.load %arg10[%c16_63, %c0_64] : memref<24x128xf32, #tpu.memory_space<vmem>>, vector<8x128xf32>
    tpu.vector_store %arg10[%c16_63, %c0_64], %112 {strides = array<i32>} : memref<24x128xf32, #tpu.memory_space<vmem>>, vector<8x128xf32>,
    %c0_65 = arith.constant 0 : index
    %c0_66 = arith.constant 0 : index
    %114 = vector.load %arg10[%c0_65, %c0_66] : memref<24x128xf32, #tpu.memory_space<vmem>>, vector<24x128xf32>
    %cst_67 = arith.constant dense<0.000000e+00> : vector<8x128xf32>
    %115 = tpu.matmul %75, %114, %cst_67 {dimension_numbers = #tpu.dot_dimension_numbers<[1], [0], [0], [1], [0, 0, 1, 1], [], []>} : vector<8x24xf32>, vector<24x128xf32>, vector<8x128xf32> -> vector<8x128xf32>
    %116 = vector.broadcast %77 : vector<8x1xf32> to vector<8x128xf32>
    %117 = arith.addf %115, %116 : vector<8x128xf32>
    %c2 = arith.constant 2 : index
    %c0_68 = arith.constant 0 : index
    %c0_69 = arith.constant 0 : index
    %118 = vector.load %arg6[%c2, %c0_68, %c0_69] : memref<8x8x128xf32, #tpu.memory_space<vmem>>, vector<1x8x128xf32>
    %119 = vector.shape_cast %118 : vector<1x8x128xf32> to vector<8x128xf32>
    %c3 = arith.constant 3 : index
    %c0_70 = arith.constant 0 : index
    %c0_71 = arith.constant 0 : index
    %120 = vector.load %arg6[%c3, %c0_70, %c0_71] : memref<8x8x128xf32, #tpu.memory_space<vmem>>, vector<1x8x128xf32>
    %121 = vector.shape_cast %120 : vector<1x8x128xf32> to vector<8x128xf32>
    %cst_72 = arith.constant dense<0.000000e+00> : vector<128xf32>
    %122 = vector.multi_reduction <add>, %117, %cst_72 [0] : vector<8x128xf32> to vector<128xf32>
    %123 = vector.shape_cast %122 : vector<128xf32> to vector<1x128xf32>
    %124 = arith.mulf %117, %117 : vector<8x128xf32>
    %cst_73 = arith.constant dense<0.000000e+00> : vector<128xf32>
    %125 = vector.multi_reduction <add>, %124, %cst_73 [0] : vector<8x128xf32> to vector<128xf32>
    %126 = vector.shape_cast %125 : vector<128xf32> to vector<1x128xf32>
    %cst_74 = arith.constant dense<0.000000e+00> : vector<1x8xf32>
    %127 = tpu.matmul %123, %0, %cst_74 {dimension_numbers = #tpu.dot_dimension_numbers<[1], [0], [0], [1], [0, 0, 1, 1], [], []>} : vector<1x128xf32>, vector<128x8xf32>, vector<1x8xf32> -> vector<1x8xf32>
    %cst_75 = arith.constant dense<0.000000e+00> : vector<1x128xf32>
    %128 = tpu.matmul %127, %1, %cst_75 {dimension_numbers = #tpu.dot_dimension_numbers<[1], [0], [0], [1], [0, 0, 1, 1], [], []>} : vector<1x8xf32>, vector<8x128xf32>, vector<1x128xf32> -> vector<1x128xf32>
    %cst_76 = arith.constant dense<0.000000e+00> : vector<1x8xf32>
    %129 = tpu.matmul %126, %0, %cst_76 {dimension_numbers = #tpu.dot_dimension_numbers<[1], [0], [0], [1], [0, 0, 1, 1], [], []>} : vector<1x128xf32>, vector<128x8xf32>, vector<1x8xf32> -> vector<1x8xf32>
    %cst_77 = arith.constant dense<0.000000e+00> : vector<1x128xf32>
    %130 = tpu.matmul %129, %1, %cst_77 {dimension_numbers = #tpu.dot_dimension_numbers<[1], [0], [0], [1], [0, 0, 1, 1], [], []>} : vector<1x8xf32>, vector<8x128xf32>, vector<1x128xf32> -> vector<1x128xf32>
    %131 = arith.mulf %128, %128 : vector<1x128xf32>
    %132 = arith.subf %130, %131 : vector<1x128xf32>
    %133 = vector.broadcast %128 : vector<1x128xf32> to vector<8x128xf32>
    %134 = arith.subf %117, %133 : vector<8x128xf32>
    %cst_78 = arith.constant 9.99999974E-6 : f32
    %135 = vector.broadcast %cst_78 : f32 to vector<1x128xf32>
    %136 = arith.addf %132, %135 : vector<1x128xf32>
    %137 = math.rsqrt %136 : vector<1x128xf32>
    %138 = vector.broadcast %137 : vector<1x128xf32> to vector<8x128xf32>
    %139 = arith.mulf %134, %138 : vector<8x128xf32>
    %140 = arith.mulf %139, %119 : vector<8x128xf32>
    %141 = arith.addf %140, %121 : vector<8x128xf32>
    %cst_79 = arith.constant 0.000000e+00 : f32
    %142 = vector.broadcast %cst_79 : f32 to vector<8x128xf32>
    %143 = arith.maximumf %141, %142 : vector<8x128xf32>
    %c1_80 = arith.constant 1 : index
    %c0_81 = arith.constant 0 : index
    %c0_82 = arith.constant 0 : index
    %144 = vector.load %arg3[%c1_80, %c0_81, %c0_82] : memref<2x8x24xf32, #tpu.memory_space<vmem>>, vector<1x8x24xf32>
    %145 = vector.shape_cast %144 : vector<1x8x24xf32> to vector<8x24xf32>
    %c2_83 = arith.constant 2 : index
    %c0_84 = arith.constant 0 : index
    %c0_85 = arith.constant 0 : index
    %146 = vector.load %arg5[%c2_83, %c0_84, %c0_85] : memref<4x8x1xf32, #tpu.memory_space<vmem>>, vector<1x8x1xf32>
    %147 = vector.shape_cast %146 : vector<1x8x1xf32> to vector<8x1xf32>
    %148 = tpu.iota {dimensions = array<i32: 1>} : vector<8x128xi32>
    %c16_i32_86 = arith.constant 16 : i32
    %c0_i32_87 = arith.constant 0 : i32
    %149 = arith.cmpi eq, %c16_i32_86, %c0_i32_87 : i32
    %c1_i32_88 = arith.constant 1 : i32
    %150 = arith.select %149, %c1_i32_88, %c16_i32_86 : i32
    %151 = vector.broadcast %150 : i32 to vector<8x128xi32>
    %152 = arith.remsi %148, %151 : vector<8x128xi32>
    %c0_i32_89 = arith.constant 0 : i32
    %153 = vector.broadcast %c0_i32_89 : i32 to vector<8x128xi32>
    %154 = arith.cmpi ne, %152, %153 : vector<8x128xi32>
    %c0_i32_90 = arith.constant 0 : i32
    %155 = vector.broadcast %c0_i32_90 : i32 to vector<8x128xi32>
    %156 = arith.cmpi slt, %152, %155 : vector<8x128xi32>
    %c0_i32_91 = arith.constant 0 : i32
    %157 = arith.cmpi slt, %150, %c0_i32_91 : i32
    %158 = vector.broadcast %157 : i1 to vector<8x128xi1>
    %159 = vector.broadcast %158 : vector<8x128xi1> to vector<8x128xi1>
    %160 = arith.xori %156, %159 : vector<8x128xi1>
    %161 = arith.andi %160, %154 : vector<8x128xi1>
    %162 = vector.broadcast %150 : i32 to vector<8x128xi32>
    %163 = arith.addi %152, %162 : vector<8x128xi32>
    %164 = arith.select %161, %163, %152 : vector<8x128xi1>, vector<8x128xi32>
    %c1_i32_92 = arith.constant 1 : i32
    %165 = tpu.dynamic_rotate %143 by %c1_i32_92 dim 1 : vector<8x128xf32>, i32 -> vector<8x128xf32>
    %c1_i32_93 = arith.constant 1 : i32
    %166 = vector.broadcast %c1_i32_93 : i32 to vector<8x128xi32>
    %167 = arith.cmpi sge, %164, %166 : vector<8x128xi32>
    %c17_i32_94 = arith.constant 17 : i32
    %168 = vector.broadcast %c17_i32_94 : i32 to vector<8x128xi32>
    %169 = arith.cmpi slt, %164, %168 : vector<8x128xi32>
    %170 = arith.andi %167, %169 : vector<8x128xi1>
    %cst_95 = arith.constant 0.000000e+00 : f32
    %171 = vector.broadcast %cst_95 : f32 to vector<8x128xf32>
    %172 = arith.select %170, %165, %171 : vector<8x128xi1>, vector<8x128xf32>
    %c0_96 = arith.constant 0 : index
    %c0_97 = arith.constant 0 : index
    %173 = vector.load %arg10[%c0_96, %c0_97] : memref<24x128xf32, #tpu.memory_space<vmem>>, vector<8x128xf32>
    tpu.vector_store %arg10[%c0_96, %c0_97], %172 {strides = array<i32>} : memref<24x128xf32, #tpu.memory_space<vmem>>, vector<8x128xf32>,
    %c8_98 = arith.constant 8 : index
    %c0_99 = arith.constant 0 : index
    %174 = vector.load %arg10[%c8_98, %c0_99] : memref<24x128xf32, #tpu.memory_space<vmem>>, vector<8x128xf32>
    tpu.vector_store %arg10[%c8_98, %c0_99], %143 {strides = array<i32>} : memref<24x128xf32, #tpu.memory_space<vmem>>, vector<8x128xf32>,
    %c127_i32_100 = arith.constant 127 : i32
    %175 = tpu.dynamic_rotate %143 by %c127_i32_100 dim 1 : vector<8x128xf32>, i32 -> vector<8x128xf32>
    %c-1_i32_101 = arith.constant -1 : i32
    %176 = vector.broadcast %c-1_i32_101 : i32 to vector<8x128xi32>
    %177 = arith.cmpi sge, %164, %176 : vector<8x128xi32>
    %c15_i32_102 = arith.constant 15 : i32
    %178 = vector.broadcast %c15_i32_102 : i32 to vector<8x128xi32>
    %179 = arith.cmpi slt, %164, %178 : vector<8x128xi32>
    %180 = arith.andi %177, %179 : vector<8x128xi1>
    %cst_103 = arith.constant 0.000000e+00 : f32
    %181 = vector.broadcast %cst_103 : f32 to vector<8x128xf32>
    %182 = arith.select %180, %175, %181 : vector<8x128xi1>, vector<8x128xf32>
    %c16_104 = arith.constant 16 : index
    %c0_105 = arith.constant 0 : index
    %183 = vector.load %arg10[%c16_104, %c0_105] : memref<24x128xf32, #tpu.memory_space<vmem>>, vector<8x128xf32>
    tpu.vector_store %arg10[%c16_104, %c0_105], %182 {strides = array<i32>} : memref<24x128xf32, #tpu.memory_space<vmem>>, vector<8x128xf32>,
    %c0_106 = arith.constant 0 : index
    %c0_107 = arith.constant 0 : index
    %184 = vector.load %arg10[%c0_106, %c0_107] : memref<24x128xf32, #tpu.memory_space<vmem>>, vector<24x128xf32>
    %cst_108 = arith.constant dense<0.000000e+00> : vector<8x128xf32>
    %185 = tpu.matmul %145, %184, %cst_108 {dimension_numbers = #tpu.dot_dimension_numbers<[1], [0], [0], [1], [0, 0, 1, 1], [], []>} : vector<8x24xf32>, vector<24x128xf32>, vector<8x128xf32> -> vector<8x128xf32>
    %186 = vector.broadcast %147 : vector<8x1xf32> to vector<8x128xf32>
    %187 = arith.addf %185, %186 : vector<8x128xf32>
    %c4 = arith.constant 4 : index
    %c0_109 = arith.constant 0 : index
    %c0_110 = arith.constant 0 : index
    %188 = vector.load %arg6[%c4, %c0_109, %c0_110] : memref<8x8x128xf32, #tpu.memory_space<vmem>>, vector<1x8x128xf32>
    %189 = vector.shape_cast %188 : vector<1x8x128xf32> to vector<8x128xf32>
    %c5 = arith.constant 5 : index
    %c0_111 = arith.constant 0 : index
    %c0_112 = arith.constant 0 : index
    %190 = vector.load %arg6[%c5, %c0_111, %c0_112] : memref<8x8x128xf32, #tpu.memory_space<vmem>>, vector<1x8x128xf32>
    %191 = vector.shape_cast %190 : vector<1x8x128xf32> to vector<8x128xf32>
    %cst_113 = arith.constant dense<0.000000e+00> : vector<128xf32>
    %192 = vector.multi_reduction <add>, %187, %cst_113 [0] : vector<8x128xf32> to vector<128xf32>
    %193 = vector.shape_cast %192 : vector<128xf32> to vector<1x128xf32>
    %194 = arith.mulf %187, %187 : vector<8x128xf32>
    %cst_114 = arith.constant dense<0.000000e+00> : vector<128xf32>
    %195 = vector.multi_reduction <add>, %194, %cst_114 [0] : vector<8x128xf32> to vector<128xf32>
    %196 = vector.shape_cast %195 : vector<128xf32> to vector<1x128xf32>
    %cst_115 = arith.constant dense<0.000000e+00> : vector<1x8xf32>
    %197 = tpu.matmul %193, %0, %cst_115 {dimension_numbers = #tpu.dot_dimension_numbers<[1], [0], [0], [1], [0, 0, 1, 1], [], []>} : vector<1x128xf32>, vector<128x8xf32>, vector<1x8xf32> -> vector<1x8xf32>
    %cst_116 = arith.constant dense<0.000000e+00> : vector<1x128xf32>
    %198 = tpu.matmul %197, %1, %cst_116 {dimension_numbers = #tpu.dot_dimension_numbers<[1], [0], [0], [1], [0, 0, 1, 1], [], []>} : vector<1x8xf32>, vector<8x128xf32>, vector<1x128xf32> -> vector<1x128xf32>
    %cst_117 = arith.constant dense<0.000000e+00> : vector<1x8xf32>
    %199 = tpu.matmul %196, %0, %cst_117 {dimension_numbers = #tpu.dot_dimension_numbers<[1], [0], [0], [1], [0, 0, 1, 1], [], []>} : vector<1x128xf32>, vector<128x8xf32>, vector<1x8xf32> -> vector<1x8xf32>
    %cst_118 = arith.constant dense<0.000000e+00> : vector<1x128xf32>
    %200 = tpu.matmul %199, %1, %cst_118 {dimension_numbers = #tpu.dot_dimension_numbers<[1], [0], [0], [1], [0, 0, 1, 1], [], []>} : vector<1x8xf32>, vector<8x128xf32>, vector<1x128xf32> -> vector<1x128xf32>
    %201 = arith.mulf %198, %198 : vector<1x128xf32>
    %202 = arith.subf %200, %201 : vector<1x128xf32>
    %203 = vector.broadcast %198 : vector<1x128xf32> to vector<8x128xf32>
    %204 = arith.subf %187, %203 : vector<8x128xf32>
    %cst_119 = arith.constant 9.99999974E-6 : f32
    %205 = vector.broadcast %cst_119 : f32 to vector<1x128xf32>
    %206 = arith.addf %202, %205 : vector<1x128xf32>
    %207 = math.rsqrt %206 : vector<1x128xf32>
    %208 = vector.broadcast %207 : vector<1x128xf32> to vector<8x128xf32>
    %209 = arith.mulf %204, %208 : vector<8x128xf32>
    %210 = arith.mulf %209, %189 : vector<8x128xf32>
    %211 = arith.addf %210, %191 : vector<8x128xf32>
    %cst_120 = arith.constant 0.000000e+00 : f32
    %212 = vector.broadcast %cst_120 : f32 to vector<8x128xf32>
    %213 = arith.maximumf %211, %212 : vector<8x128xf32>
    %c0_121 = arith.constant 0 : index
    %c0_122 = arith.constant 0 : index
    %214 = vector.load %arg4[%c0_121, %c0_122] : memref<8x4xf32, #tpu.memory_space<vmem>>, vector<8x4xf32>
    %cst_123 = arith.constant dense<0.000000e+00> : vector<8x128xf32>
    %215 = tpu.matmul %214, %4, %cst_123 {dimension_numbers = #tpu.dot_dimension_numbers<[1], [0], [0], [1], [0, 0, 1, 1], [], []>} : vector<8x4xf32>, vector<4x128xf32>, vector<8x128xf32> -> vector<8x128xf32>
    %c3_124 = arith.constant 3 : index
    %c0_125 = arith.constant 0 : index
    %c0_126 = arith.constant 0 : index
    %216 = vector.load %arg5[%c3_124, %c0_125, %c0_126] : memref<4x8x1xf32, #tpu.memory_space<vmem>>, vector<1x8x1xf32>
    %217 = vector.shape_cast %216 : vector<1x8x1xf32> to vector<8x1xf32>
    %218 = vector.broadcast %217 : vector<8x1xf32> to vector<8x128xf32>
    %219 = arith.addf %215, %218 : vector<8x128xf32>
    %c6 = arith.constant 6 : index
    %c0_127 = arith.constant 0 : index
    %c0_128 = arith.constant 0 : index
    %220 = vector.load %arg6[%c6, %c0_127, %c0_128] : memref<8x8x128xf32, #tpu.memory_space<vmem>>, vector<1x8x128xf32>
    %221 = vector.shape_cast %220 : vector<1x8x128xf32> to vector<8x128xf32>
    %c7 = arith.constant 7 : index
    %c0_129 = arith.constant 0 : index
    %c0_130 = arith.constant 0 : index
    %222 = vector.load %arg6[%c7, %c0_129, %c0_130] : memref<8x8x128xf32, #tpu.memory_space<vmem>>, vector<1x8x128xf32>
    %223 = vector.shape_cast %222 : vector<1x8x128xf32> to vector<8x128xf32>
    %cst_131 = arith.constant dense<0.000000e+00> : vector<128xf32>
    %224 = vector.multi_reduction <add>, %219, %cst_131 [0] : vector<8x128xf32> to vector<128xf32>
    %225 = vector.shape_cast %224 : vector<128xf32> to vector<1x128xf32>
    %226 = arith.mulf %219, %219 : vector<8x128xf32>
    %cst_132 = arith.constant dense<0.000000e+00> : vector<128xf32>
    %227 = vector.multi_reduction <add>, %226, %cst_132 [0] : vector<8x128xf32> to vector<128xf32>
    %228 = vector.shape_cast %227 : vector<128xf32> to vector<1x128xf32>
    %cst_133 = arith.constant dense<0.000000e+00> : vector<1x8xf32>
    %229 = tpu.matmul %225, %0, %cst_133 {dimension_numbers = #tpu.dot_dimension_numbers<[1], [0], [0], [1], [0, 0, 1, 1], [], []>} : vector<1x128xf32>, vector<128x8xf32>, vector<1x8xf32> -> vector<1x8xf32>
    %cst_134 = arith.constant dense<0.000000e+00> : vector<1x128xf32>
    %230 = tpu.matmul %229, %1, %cst_134 {dimension_numbers = #tpu.dot_dimension_numbers<[1], [0], [0], [1], [0, 0, 1, 1], [], []>} : vector<1x8xf32>, vector<8x128xf32>, vector<1x128xf32> -> vector<1x128xf32>
    %cst_135 = arith.constant dense<0.000000e+00> : vector<1x8xf32>
    %231 = tpu.matmul %228, %0, %cst_135 {dimension_numbers = #tpu.dot_dimension_numbers<[1], [0], [0], [1], [0, 0, 1, 1], [], []>} : vector<1x128xf32>, vector<128x8xf32>, vector<1x8xf32> -> vector<1x8xf32>
    %cst_136 = arith.constant dense<0.000000e+00> : vector<1x128xf32>
    %232 = tpu.matmul %231, %1, %cst_136 {dimension_numbers = #tpu.dot_dimension_numbers<[1], [0], [0], [1], [0, 0, 1, 1], [], []>} : vector<1x8xf32>, vector<8x128xf32>, vector<1x128xf32> -> vector<1x128xf32>
    %233 = arith.mulf %230, %230 : vector<1x128xf32>
    %234 = arith.subf %232, %233 : vector<1x128xf32>
    %235 = vector.broadcast %230 : vector<1x128xf32> to vector<8x128xf32>
    %236 = arith.subf %219, %235 : vector<8x128xf32>
    %cst_137 = arith.constant 9.99999974E-6 : f32
    %237 = vector.broadcast %cst_137 : f32 to vector<1x128xf32>
    %238 = arith.addf %234, %237 : vector<1x128xf32>
    %239 = math.rsqrt %238 : vector<1x128xf32>
    %240 = vector.broadcast %239 : vector<1x128xf32> to vector<8x128xf32>
    %241 = arith.mulf %236, %240 : vector<8x128xf32>
    %242 = arith.mulf %241, %221 : vector<8x128xf32>
    %243 = arith.addf %242, %223 : vector<8x128xf32>
    %244 = arith.addf %243, %213 : vector<8x128xf32>
    %cst_138 = arith.constant 0.000000e+00 : f32
    %245 = vector.broadcast %cst_138 : f32 to vector<8x128xf32>
    %246 = arith.maximumf %244, %245 : vector<8x128xf32>
    %c0_139 = arith.constant 0 : index
    %c0_140 = arith.constant 0 : index
    %247 = vector.load %arg9[%c0_139, %c0_140] : memref<8x128xf32, #tpu.memory_space<vmem>>, vector<8x128xf32>
    tpu.vector_store %arg9[%c0_139, %c0_140], %246 {strides = array<i32>} : memref<8x128xf32, #tpu.memory_space<vmem>>, vector<8x128xf32>,
    return
  }
  func.func @transform_0(%arg0: i32) -> (i32, i32) {
    %c0_i32 = arith.constant 0 : i32
    %c0_i32_0 = arith.constant 0 : i32
    return %c0_i32, %arg0 : i32, i32
  }
  func.func @transform_1(%arg0: i32) -> (i32, i32) {
    %c0_i32 = arith.constant 0 : i32
    %c0_i32_0 = arith.constant 0 : i32
    %c0_i32_1 = arith.constant 0 : i32
    return %c0_i32, %c0_i32_0 : i32, i32
  }
  func.func @transform_2(%arg0: i32) -> (i32, i32, i32) {
    %c0_i32 = arith.constant 0 : i32
    %c0_i32_0 = arith.constant 0 : i32
    %c0_i32_1 = arith.constant 0 : i32
    %c0_i32_2 = arith.constant 0 : i32
    return %c0_i32, %c0_i32_0, %c0_i32_1 : i32, i32, i32
  }
  func.func @transform_3(%arg0: i32) -> (i32, i32) {
    %c0_i32 = arith.constant 0 : i32
    %c0_i32_0 = arith.constant 0 : i32
    %c0_i32_1 = arith.constant 0 : i32
    return %c0_i32, %c0_i32_0 : i32, i32
  }
  func.func @transform_4(%arg0: i32) -> (i32, i32, i32) {
    %c0_i32 = arith.constant 0 : i32
    %c0_i32_0 = arith.constant 0 : i32
    %c0_i32_1 = arith.constant 0 : i32
    %c0_i32_2 = arith.constant 0 : i32
    return %c0_i32, %c0_i32_0, %c0_i32_1 : i32, i32, i32
  }
  func.func @transform_5(%arg0: i32) -> (i32, i32, i32) {
    %c0_i32 = arith.constant 0 : i32
    %c0_i32_0 = arith.constant 0 : i32
    %c0_i32_1 = arith.constant 0 : i32
    %c0_i32_2 = arith.constant 0 : i32
    return %c0_i32, %c0_i32_0, %c0_i32_1 : i32, i32, i32
  }
  func.func @transform_6(%arg0: i32) -> (i32, i32) {
    %c0_i32 = arith.constant 0 : i32
    %c0_i32_0 = arith.constant 0 : i32
    %c0_i32_1 = arith.constant 0 : i32
    return %c0_i32, %c0_i32_0 : i32, i32
  }
  func.func @transform_7(%arg0: i32) -> (i32, i32) {
    %c0_i32 = arith.constant 0 : i32
    %c0_i32_0 = arith.constant 0 : i32
    %c0_i32_1 = arith.constant 0 : i32
    return %c0_i32, %c0_i32_0 : i32, i32
  }
  func.func @transform_8(%arg0: i32) -> (i32, i32) {
    %c0_i32 = arith.constant 0 : i32
    %c0_i32_0 = arith.constant 0 : i32
    return %c0_i32, %arg0 : i32, i32
  }
}

</mosaic_0001>

<bundles_post_ra>
// kernel: tpu_custom_call.1
= control target key start
LH: loop header
LB: loop body
LE: loop exit
PB: predicated region body
PF: predicated region fallthrough
CT: control target
= control target key end

     0   :  { %13 = vsyncpa [#allocation4], 0  ;;  %s3493_s0 = inlined_call_operand.vmem [shape: f32[4,256], index: 0, kind: input, shape index: {}]   ;;  %s3494_s1 = inlined_call_operand.vmem [shape: f32[8,24], index: 1, kind: input, shape index: {}]   ;;  %s3495_s2 = inlined_call_operand.vmem [shape: f32[2,8,24], index: 2, kind: input, shape index: {}]   ;;  %s3496_s3 = inlined_call_operand.vmem [shape: f32[8,4], index: 3, kind: input, shape index: {}]   ;;  %s3497_s4 = inlined_call_operand.vmem [shape: f32[4,8,1], index: 4, kind: input, shape index: {}]   ;;  %s3498_s5 = inlined_call_operand.vmem [shape: f32[8,8,128], index: 5, kind: input, shape index: {}]   ;;  %s3499_s6 = inlined_call_operand.vmem [shape: f32[128,8], index: 6, kind: input, shape index: {}]   ;;  %s3500_s7 = inlined_call_operand.vmem [shape: f32[8,128], index: 7, kind: input, shape index: {}]   ;;  %s3501_s8 = inlined_call_operand.hbm [shape: f32[8,256], index: 8, kind: output, shape index: {}]  }
   0x1   :  { %15 = vsyncpa [#allocation4 + $0x1], 0  ;;  %s2996_s27 = smov 0   ;;  %s2998_s28 = smov 0  }
   0x2   :  { %s3000_s29 = smov 0   ;;  %s3002_s30 = smov 0  }
   0x3 LB: > { %s3017_s9 = sadd.s32 4294967295, %s2941_s30   ;;  %s2063_s10 = sadd.s32 4294967294, %s2941_s30   ;;  %s2941_s30 = sphi %s3002_s30, %s3513_s30   ;;  %s2937_s29 = sphi %s3000_s29, %s3512_s29   ;;  %s2933_s28 = sphi %s2998_s28, %s3511_s28   ;;  %s2929_s27 = sphi %s2996_s27, %s3510_s27  }
   0x4   : > { %s3021_s11 = sadd.s32 1, %s2941_s30   ;;  %s201_s12 = sadd.s32 1, %s2937_s29 }
   0x5   : > { %s198_s13 = ssub.s32 %s2941_s30, %s3021_s11  ;;  %p211_p0 = scmp.ne.s32.totalorder %s2937_s29, %s2933_s28 }
   0x6   : > { %p199_p1 = scmp.eq.s32.totalorder %s198_s13, 0  ;;  %p212_p2 = scmp.eq.s32.totalorder %s3017_s9, 1 }
   0x7   : > { %p217_p3 = scmp.ne.s32.totalorder %s2933_s28, %s2929_s27  ;;  %p218_p4 = scmp.eq.s32.totalorder %s2063_s10, 1 }
   0x8   : > { %s3032_s14 = scalar_select %p199_p1, %s2937_s29, %s201_s12  }
   0x9   : > { %p3034_p5 = por %p212_p2, %p211_p0  ;;  %p3038_p6 = por %p218_p4, %p217_p3 }
   0xa   : > { %p2066_p7 = scmp.ge.s32.totalorder %s2941_s30, 1  ;;  %p264_p8 = scmp.lt.s32.totalorder %s2941_s30, 3 }
   0xc   : > { %p265_p9 = pnand %p2066_p7, %p264_p8 }
   0xd   : > { %p297_p10 = scmp.lt.s32.totalorder (!%p265_p9), %s3017_s9, 1  ;;  %v2943_v0 = vmov (!%p265_p9), 0.0   ;;  %v2944_v1 = vmov (!%p265_p9), 0.0|0.0   ;;  %s2945_s22 = smov (!%p265_p9), 1   ;;  %vm2946_vm0 = vmmov (!%p265_p9), 0   ;;  %v323_v3 = vld [vmem:[%s3497_s4] sm:$0xff] (!%p265_p9)  ;;  %v324_v17 = vlaneseq (!%p265_p9) }
   0xe   : > { %268 = sbr.rel (%p265_p9) target bundleno = 3860 (0xf14), region = 52  ;;  %319 = vst [vmem:[#allocation2 + $0x8] sm:$0xff] (!%p265_p9), %v2943_v0  ;;  %318 = vst [vmem:[#allocation2] sm:$0xff] (!%p265_p9), %v2943_v0  ;;  %2615 = vmatprep.subr.bf16.mxu0 (!%p265_p9), %v2944_v1  ;;  %2618 = vmatprep.subr.bf16.mxu1 (!%p265_p9), %v2944_v1  ;;  %v301_v4 = vld [vmem:[%s3499_s6] sm:$0xff] (!%p265_p9)  ;;  %v302_v5 = vld [vmem:[%s3499_s6 + $0x8] sm:$0xff] (!%p265_p9)  ;;  %s2947_s13 = smov (!%p265_p9), 127  }
   0xf   : > { %320 = vst [vmem:[#allocation2 + $0x10] sm:$0xff] (!%p265_p9), %v2943_v0  ;;  %2269 = vmatprep.mubr.msk.f32.mxu0 (!%p265_p9), %vm2946_vm0, %v2943_v0  ;;  %2304 = vmatprep.mubr.msk.f32.mxu1 (!%p265_p9), %vm2946_vm0, %v2943_v0  ;;  %v2948_v6 = vmov (!%p265_p9), 0   ;;  %v3074_v7 = vpack.c.bf16 (!%p265_p9), %v302_v5, %v301_v4  ;;  %v303_v8 = vld [vmem:[%s3499_s6 + $0x10] sm:$0xff] (!%p265_p9)  ;;  %v304_v9 = vld [vmem:[%s3499_s6 + $0x18] sm:$0xff] (!%p265_p9)  ;;  %v305_v11 = vld [vmem:[%s3499_s6 + $0x20] sm:$0xff] (!%p265_p9)  ;;  %v325_v18 = vand.u32 (!%p265_p9), 127, %v324_v17 }
  0x10   : > { %2861 = vset.pattern.permute.xlu1 (!%p265_p9), %v2948_v6  ;;  %2862 = vset.pattern.permute.xlu0 (!%p265_p9), %v2948_v6  ;;  %v3083_v10 = vpack.c.bf16 (!%p265_p9), %v304_v9, %v303_v8  ;;  %v306_v12 = vld [vmem:[%s3499_s6 + $0x28] sm:$0xff] (!%p265_p9)  ;;  %v307_v14 = vld [vmem:[%s3499_s6 + $0x30] sm:$0xff] (!%p265_p9)  ;;  %v308_v15 = vld [vmem:[%s3499_s6 + $0x38] sm:$0xff] (!%p265_p9)  ;;  %vm361_vm3 = vcmask (!%p265_p9), 195584   ;;  %vm521_vm4 = vcmask (!%p265_p9), 64512   ;;  %vm2949_vm5 = vmmov (!%p265_p9), 1  }
  0x11   : > { %358 = vperm.xlu1 (!%p265_p9), %2861, %v323_v3   ;;  %2620 = vmatpush3.bf16.msra.mxu1 (!%p265_p9), %v3074_v7  ;;  %v3093_v13 = vpack.c.bf16 (!%p265_p9), %v306_v12, %v305_v11  ;;  %v3103_v16 = vpack.c.bf16 (!%p265_p9), %v308_v15, %v307_v14  ;;  %v330_v19 = vand.u32 (!%p265_p9), 15, %v325_v18  ;;  %v322_v30 = vld [vmem:[%s3494_s1] sm:$0xff] (!%p265_p9)  ;;  %v310_v32 = vld [vmem:[%s3499_s6 + $0x48] sm:$0xff] (!%p265_p9)  ;;  %v311_v34 = vld [vmem:[%s3499_s6 + $0x50] sm:$0xff] (!%p265_p9)  ;;  %v741_v14 = vshrl.u32 (!%p265_p9), %v324_v17, 7  ;;  %s294_s26 = sand.u32 (!%p265_p9), 1, %s2933_s28  }
  0x12   : > { %2621 = vmatprep.subr.bf16.mxu1 (!%p265_p9), %v2944_v1  ;;  %v309_v31 = vld [vmem:[%s3499_s6 + $0x40] sm:$0xff] (!%p265_p9)  ;;  %v312_v35 = vld [vmem:[%s3499_s6 + $0x58] sm:$0xff] (!%p265_p9)  ;;  %v314_v38 = vld [vmem:[%s3499_s6 + $0x68] sm:$0xff] (!%p265_p9)  ;;  %vm1594_vm7 = vcmask (!%p265_p9), 1043456   ;;  %vm1590_vm8 = vcmask (!%p265_p9), 31744   ;;  %s1991_s12 = scalar_lea.sflag (!%p265_p9), [#allocation4], %s294_s26 }
  0x13   : > { %vm3109_vm1 = vcmp.ge.s32.totalorder (!%p265_p9), %v330_v19, 1  ;;  %vm3115_vm2 = vcmp.lt.s32.totalorder (!%p265_p9), %v330_v19, 15  ;;  %v3135_v33 = vpack.c.bf16 (!%p265_p9), %v310_v32, %v309_v31  ;;  %v3145_v36 = vpack.c.bf16 (!%p265_p9), %v312_v35, %v311_v34  ;;  %v313_v37 = vld [vmem:[%s3499_s6 + $0x60] sm:$0xff] (!%p265_p9)  ;;  %v315_v40 = vld [vmem:[%s3499_s6 + $0x70] sm:$0xff] (!%p265_p9)  ;;  %v316_v41 = vld [vmem:[%s3499_s6 + $0x78] sm:$0xff] (!%p265_p9) }
  0x14   : > { %v3155_v39 = vpack.c.bf16 (!%p265_p9), %v314_v38, %v313_v37  ;;  %v3164_v42 = vpack.c.bf16 (!%p265_p9), %v316_v41, %v315_v40  ;;  %v3172_v43 = vld [vmem:[%s3500_s7] sm:$0xff] (!%p265_p9)  ;;  %v3227_v15 = vsub.s32 (!%p265_p9), 0, %v741_v14  ;;  %vm3245_vm6 = vmpackc.low (!%p265_p9), %vm2949_vm5, %vm3109_vm1  ;;  %v2075_v14 = vld [vmem:[%s3498_s5 + $0x10] sm:$0xff] (!%p265_p9) }
  0x15   : > { %s298_s17 = scalar_select %p297_p10, %s3017_s9, 1  ;;  %2623 = vmatpush3.bf16.msra.mxu1 %v3083_v10  ;;  %v755_v35 = vld [vmem:[%s3495_s2] sm:$0xff] }
  0x16   : > { %2624 = vmatprep.subr.bf16.mxu1 %v2944_v1 }
  0x17   : > { %s2068_s18 = sshll.u32 %s298_s17, 2  ;;  %s2067_s17 = sshll.u32 %s294_s26, 3 }
  0x18   : > { %s300_s21 = scalar_lea.vmem %s3493_s0, %s2068_s18 }
  0x19   : > { %v3054_v2 = vld [vmem:[%s300_s21] sm:$0xf]  ;;  %2626 = vmatpush3.bf16.msra.mxu1 %v3093_v13  ;;  %s296_s21 = scalar_lea.vmem [#allocation3], %s2067_s17 }
  0x1a   : > { %338 = vrot.lane.b32.xlu0 %v3054_v2, %s2945_s22  ;;  %345 = vst [vmem:[#allocation2 + $0x8] sm:$0xf] %v3054_v2  ;;  %2627 = vmatprep.subr.bf16.mxu1 %v2944_v1  ;;  %s2004_s23 = sshll.u32 %s296_s21, 4  ;;  %s3453_s23 = int_to_ptr.vmem [resolvable:$true] %s2004_s23 }
  0x1b   : > { %s2879_s18 = scalar_lea.vmem %s3453_s23, 128 }
  0x1c   : > { %p2880_p11 = scmp.ne.s32.totalorder %s3453_s23, %s2879_s18 }
  0x1d   : > { %2629 = vmatpush3.bf16.msra.mxu1 %v3103_v16 }
  0x1e   : > { %346 = vrot.lane.b32.xlu0 %v3054_v2, %s2947_s13  ;;  %2630 = vmatprep.subr.bf16.mxu1 %v2944_v1  ;;  %p2881_p12 = pnand %p2880_p11, %p3034_p5 }
  0x20   : > { %p2882_p13 = pneg %p2881_p12 }
  0x21   : > { %v354_v26 = vld [vmem:[#allocation2 + $0x8] sm:$0xff]  ;;  %2632 = vmatpush3.bf16.msra.mxu1 %v3135_v33 }
  0x22   : > { %2633 = vmatprep.subr.bf16.mxu1 %v2944_v1 }
  0x25   : > { %2635 = vmatpush3.bf16.msra.mxu1 %v3145_v36 }
  0x26   : > { %2636 = vmatprep.subr.bf16.mxu1 %v2944_v1 }
  0x29   : > { %2638 = vmatpush3.bf16.msra.mxu1 %v3155_v39 }
  0x2a   : > { %2639 = vmatprep.subr.bf16.mxu1 %v2944_v1 }
  0x2d   : > { %2641 = vmatpush3.bf16.msra.mxu1 %v3164_v42 }
  0x2e   : > { %2347 = vmatprep.subr.mxu1 %v2943_v0 }
  0x8c   : > { %v339_v21 = vpop.permute.xlu0 %338 }
  0x8d   : > { %v343_v22 = vsel %vm3109_vm1, %v339_v21, 0.0 }
  0x8e   : > { %344 = vst [vmem:[#allocation2] sm:$0xf] %v343_v22 }
  0x90   : > { %v347_v24 = vpop.permute.xlu0 %346  ;;  %v359_v44 = vpop.permute.xlu1 %358 }
  0x91   : > { %v351_v25 = vsel %vm3115_vm2, %v347_v24, 0.0  ;;  %v435_v24 = vld [vmem:[%s3498_s5] sm:$0xff] }
  0x92   : > { %352 = vst [vmem:[#allocation2 + $0x10] sm:$0xf] %v351_v25 }
  0x95   : > { %v353_v27 = vld [vmem:[#allocation2] sm:$0xff] }
  0x96   : > { %v2616_v28 = vpack.c.bf16 %v354_v26, %v353_v27  ;;  %v2070_v26 = vld [vmem:[%s3498_s5 + $0x8] sm:$0xff] }
  0x98   : > { %2617 = vmatpush3.bf16.msra.mxu0 %v2616_v28 }
  0x99   : > { %2267 = vmatprep.subr.mxu0 %v2943_v0  ;;  %v355_v29 = vld [vmem:[#allocation2 + $0x10] sm:$0xff] }
  0x9c   : > { %2268 = vmatpush3.msra.mxu0 %v355_v29  ;;  %v2073_v29 = vld [vmem:[%s3497_s4 + $0x8] sm:$0xff] }
  0x9d   : > { %2270 = vmatmul.mubr.msk.f32.vlgmr.msra.gmra.mrb[0].mxu0 %vm361_vm3, %v322_v30  ;;  %2307 = vmatprep.subr.mxu0 %v2943_v0 }
  0x9e   : > { %2309 = vmatprep.mubr.msk.f32.mxu0 %vm2946_vm0, %v2943_v0  ;;  %2308 = vmatpush3.msra.mxu0 %v3172_v43 }
  0x9f   : > { %2642 = vmatprep.subr.bf16.mxu0 %v2944_v1 }
 0x170   : > { %v431_v45 = vpop.f32.mrb[0].mxu0 }
 0x171   : > { %v3176_v46 = vadd.f32 %v431_v45, %v359_v44  ;;  %v2271_v47 = vpop.f32.mrb[1].mxu0 }
 0x173   : > { %v438_v48 = vrot.slane %v3176_v46, 4  ;;  %v444_v56 = vmul.f32 %v3176_v46, %v3176_v46 }
 0x175   : > { %v439_v49 = vadd.f32 %v438_v48, %v3176_v46  ;;  %v445_v57 = vrot.slane %v444_v56, 4 }
 0x177   : > { %v440_v50 = vrot.slane %v439_v49, 2  ;;  %v446_v58 = vadd.f32 %v445_v57, %v444_v56 }
 0x179   : > { %v441_v51 = vadd.f32 %v440_v50, %v439_v49  ;;  %v447_v59 = vrot.slane %v446_v58, 2 }
 0x17b   : > { %v442_v52 = vrot.slane %v441_v51, 1  ;;  %v448_v60 = vadd.f32 %v447_v59, %v446_v58 }
 0x17d   : > { %v443_v53 = vadd.f32 %v442_v52, %v441_v51  ;;  %v449_v61 = vrot.slane %v448_v60, 1 }
 0x17f   : > { %2305 = vmatmul.mubr.f32.vlgmr.msra.gmra.mrb[0].mxu1 %v443_v53  ;;  %v450_v62 = vadd.f32 %v449_v61, %v448_v60 }
 0x180   : > { %2348 = vmatpush3.msra.mxu1 %v3172_v43  ;;  %2349 = vmatprep.mubr.msk.f32.mxu1 %vm2946_vm0, %v2943_v0 }
 0x181   : > { %2666 = vmatprep.subr.bf16.mxu1 %v2944_v1 }
 0x252   : > { %v517_v54 = vpop.f32.mrb[0].mxu1 }
 0x253   : > { %v2306_v55 = vpop.f32.mrb[1].mxu1  ;;  %2310 = vmatmul.mubr.msk.f32.vlgmr.msra.gmra.mrb[2].mxu0 %vm521_vm4, %v517_v54 }
 0x254   : > { %2644 = vmatpush3.bf16.msra.mxu0 %v3074_v7  ;;  %2344 = vmatprep.mubr.msk.f32.mxu0 %vm2946_vm0, %v2943_v0 }
 0x255   : > { %2645 = vmatprep.subr.bf16.mxu0 %v2944_v1 }
 0x258   : > { %2647 = vmatpush3.bf16.msra.mxu0 %v3083_v10 }
 0x259   : > { %2648 = vmatprep.subr.bf16.mxu0 %v2944_v1 }
 0x25c   : > { %2650 = vmatpush3.bf16.msra.mxu0 %v3093_v13 }
 0x25d   : > { %2651 = vmatprep.subr.bf16.mxu0 %v2944_v1 }
 0x260   : > { %2653 = vmatpush3.bf16.msra.mxu0 %v3103_v16 }
 0x261   : > { %2654 = vmatprep.subr.bf16.mxu0 %v2944_v1 }
 0x264   : > { %2656 = vmatpush3.bf16.msra.mxu0 %v3135_v33 }
 0x265   : > { %2657 = vmatprep.subr.bf16.mxu0 %v2944_v1 }
 0x268   : > { %2659 = vmatpush3.bf16.msra.mxu0 %v3145_v36 }
 0x269   : > { %2660 = vmatprep.subr.bf16.mxu0 %v2944_v1 }
 0x26c   : > { %2662 = vmatpush3.bf16.msra.mxu0 %v3155_v39 }
 0x26d   : > { %2663 = vmatprep.subr.bf16.mxu0 %v2944_v1 }
 0x270   : > { %2665 = vmatpush3.bf16.msra.mxu0 %v3164_v42 }
 0x271   : > { %2669 = vmatprep.subr.bf16.mxu0 %v2944_v1 }
 0x273   : > { %2345 = vmatmul.mubr.f32.vlgmr.msra.gmra.mrb[4].mxu0 %v450_v62 }
 0x274   : > { %2671 = vmatpush3.bf16.msra.mxu0 %v3074_v7  ;;  %2393 = vmatprep.mubr.msk.f32.mxu0 %vm2946_vm0, %v2943_v0 }
 0x275   : > { %2672 = vmatprep.subr.bf16.mxu0 %v2944_v1 }
 0x278   : > { %2674 = vmatpush3.bf16.msra.mxu0 %v3083_v10 }
 0x279   : > { %2675 = vmatprep.subr.bf16.mxu0 %v2944_v1 }
 0x27c   : > { %2677 = vmatpush3.bf16.msra.mxu0 %v3093_v13 }
 0x27d   : > { %2678 = vmatprep.subr.bf16.mxu0 %v2944_v1 }
 0x280   : > { %2680 = vmatpush3.bf16.msra.mxu0 %v3103_v16 }
 0x281   : > { %2681 = vmatprep.subr.bf16.mxu0 %v2944_v1 }
 0x284   : > { %2683 = vmatpush3.bf16.msra.mxu0 %v3135_v33 }
 0x285   : > { %2684 = vmatprep.subr.bf16.mxu0 %v2944_v1 }
 0x288   : > { %2686 = vmatpush3.bf16.msra.mxu0 %v3145_v36 }
 0x289   : > { %2687 = vmatprep.subr.bf16.mxu0 %v2944_v1 }
 0x28c   : > { %2689 = vmatpush3.bf16.msra.mxu0 %v3155_v39 }
 0x28d   : > { %2690 = vmatprep.subr.bf16.mxu0 %v2944_v1 }
 0x290   : > { %2692 = vmatpush3.bf16.msra.mxu0 %v3164_v42 }
 0x291   : > { %2436 = vmatprep.subr.mxu0 %v2943_v0 }
 0x326   : > { %v591_v63 = vpop.f32.mrb[2].mxu0 }
 0x327   : > { %v2311_v3 = vpop.f32.mrb[3].mxu0  ;;  %v738_v6 = vmul.f32 %v591_v63, %v591_v63  ;;  %v743_v18 = vrot.slane %v591_v63, %v3227_v15 }
 0x329   : > { %v744_v21 = vsub.f32 %v3176_v46, %v743_v18 }
 0x346   : > { %v661_v4 = vpop.f32.mrb[4].mxu0 }
 0x347   : > { %v2346_v5 = vpop.f32.mrb[5].mxu0  ;;  %2350 = vmatmul.mubr.msk.f32.vlgmr.msra.gmra.mrb[2].mxu1 %vm521_vm4, %v661_v4 }
 0x348   : > { %2358 = vmatprep.mubr.msk.f32.mxu1 %vm2946_vm0, %v2943_v0 }
 0x41a   : > { %v734_v8 = vpop.f32.mrb[2].mxu1 }
 0x41b   : > { %v739_v9 = vsub.f32 %v734_v8, %v738_v6  ;;  %v2351_v11 = vpop.f32.mrb[3].mxu1 }
 0x41d   : > { %v745_v12 = vadd.f32 1e-05, %v739_v9 }
 0x41f   : > { %2863 = vrsqrt.f32 %v745_v12 }
 0x429   : > { %v2864_v19 = vpop.eup %2863 }
 0x42a   : > { %v750_v22 = vrot.slane %v2864_v19, %v3227_v15  ;;  %v2076_v19 = vld [vmem:[%s3498_s5 + $0x18] sm:$0xff] }
 0x42c   : > { %v751_v25 = vmul.f32 %v750_v22, %v744_v21 }
 0x42e   : > { %v752_v17 = vmul.f32 %v751_v25, %v435_v24  ;;  %v2086_v25 = vld [vmem:[%s3497_s4 + $0x18] sm:$0xff] }
 0x430   : > { %v753_v27 = vadd.f32 %v2070_v26, %v752_v17  ;;  %v2080_v26 = vld [vmem:[%s3497_s4 + $0x10] sm:$0xff] }
 0x432   : > { %v754_v28 = vmax.f32 %v753_v27, 0.0 }
 0x434   : > { %763 = vrot.lane.b32.xlu0 %v754_v28, %s2947_s13  ;;  %758 = vrot.lane.b32.xlu1 %v754_v28, %s2945_s22 }
 0x438   : > { %772 = vperm.xlu1 %2861, %v2073_v29  }
 0x4a6   : > { %v759_v30 = vpop.permute.xlu1 %758  ;;  %v764_v31 = vpop.permute.xlu0 %763 }
 0x4a7   : > { %v2872_v34 = vpack.c.bf16 %v754_v28, %v759_v30 }
 0x4a9   : > { %2873 = vmatpush3.bf16.msk.msra.mxu1 %vm3245_vm6, %v2872_v34 }
 0x4aa   : > { %2356 = vmatprep.subr.mxu1 %v2943_v0 }
 0x4ad   : > { %2874 = vmatpush3.msk.msra.mxu1 %vm3115_vm2, %v764_v31  ;;  %v2079_v31 = vld [vmem:[%s3495_s2 + $0x8] sm:$0xff] }
 0x4ae   : > { %2359 = vmatmul.mubr.msk.f32.vlgmr.msra.gmra.mrb[4].mxu1 %vm361_vm3, %v755_v35  ;;  %2396 = vmatprep.subr.mxu1 %v2943_v0 }
 0x4af   : > { %2397 = vmatpush3.msra.mxu1 %v3172_v43  ;;  %2398 = vmatprep.mubr.msk.f32.mxu1 %vm2946_vm0, %v2943_v0 }
 0x4b0   : > { %2693 = vmatprep.subr.bf16.mxu1 %v2944_v1 }
 0x4b7   : > { %v773_v37 = vpop.permute.xlu1 %772 }
 0x581   : > { %v844_v38 = vpop.f32.mrb[4].mxu1 }
 0x582   : > { %v3263_v40 = vadd.f32 %v844_v38, %v773_v37  ;;  %v2360_v41 = vpop.f32.mrb[5].mxu1 }
 0x584   : > { %v852_v44 = vrot.slane %v3263_v40, 4  ;;  %v858_v52 = vmul.f32 %v3263_v40, %v3263_v40 }
 0x586   : > { %v853_v45 = vadd.f32 %v852_v44, %v3263_v40  ;;  %v859_v53 = vrot.slane %v858_v52, 4 }
 0x588   : > { %v854_v46 = vrot.slane %v853_v45, 2  ;;  %v860_v54 = vadd.f32 %v859_v53, %v858_v52 }
 0x58a   : > { %v855_v47 = vadd.f32 %v854_v46, %v853_v45  ;;  %v861_v55 = vrot.slane %v860_v54, 2 }
 0x58c   : > { %v856_v48 = vrot.slane %v855_v47, 1  ;;  %v862_v56 = vadd.f32 %v861_v55, %v860_v54 }
 0x58e   : > { %v857_v49 = vadd.f32 %v856_v48, %v855_v47  ;;  %v863_v57 = vrot.slane %v862_v56, 1 }
 0x590   : > { %2394 = vmatmul.mubr.f32.vlgmr.msra.gmra.mrb[6].mxu0 %v857_v49  ;;  %v864_v58 = vadd.f32 %v863_v57, %v862_v56 }
 0x591   : > { %2437 = vmatpush3.msra.mxu0 %v3172_v43  ;;  %2438 = vmatprep.mubr.msk.f32.mxu0 %vm2946_vm0, %v2943_v0 }
 0x592   : > { %2717 = vmatprep.subr.bf16.mxu0 %v2944_v1 }
 0x663   : > { %v931_v50 = vpop.f32.mrb[6].mxu0 }
 0x664   : > { %v2395_v51 = vpop.f32.mrb[7].mxu0  ;;  %2399 = vmatmul.mubr.msk.f32.vlgmr.msra.gmra.mrb[6].mxu1 %vm521_vm4, %v931_v50 }
 0x665   : > { %2695 = vmatpush3.bf16.msra.mxu1 %v3074_v7  ;;  %2433 = vmatprep.mubr.msk.f32.mxu1 %vm2946_vm0, %v2943_v0 }
 0x666   : > { %2696 = vmatprep.subr.bf16.mxu1 %v2944_v1 }
 0x669   : > { %2698 = vmatpush3.bf16.msra.mxu1 %v3083_v10 }
 0x66a   : > { %2699 = vmatprep.subr.bf16.mxu1 %v2944_v1 }
 0x66d   : > { %2701 = vmatpush3.bf16.msra.mxu1 %v3093_v13 }
 0x66e   : > { %2702 = vmatprep.subr.bf16.mxu1 %v2944_v1 }
 0x671   : > { %2704 = vmatpush3.bf16.msra.mxu1 %v3103_v16 }
 0x672   : > { %2705 = vmatprep.subr.bf16.mxu1 %v2944_v1 }
 0x675   : > { %2707 = vmatpush3.bf16.msra.mxu1 %v3135_v33 }
 0x676   : > { %2708 = vmatprep.subr.bf16.mxu1 %v2944_v1 }
 0x679   : > { %2710 = vmatpush3.bf16.msra.mxu1 %v3145_v36 }
 0x67a   : > { %2711 = vmatprep.subr.bf16.mxu1 %v2944_v1 }
 0x67d   : > { %2713 = vmatpush3.bf16.msra.mxu1 %v3155_v39 }
 0x67e   : > { %2714 = vmatprep.subr.bf16.mxu1 %v2944_v1 }
 0x681   : > { %2716 = vmatpush3.bf16.msra.mxu1 %v3164_v42 }
 0x682   : > { %2720 = vmatprep.subr.bf16.mxu1 %v2944_v1 }
 0x684   : > { %2434 = vmatmul.mubr.f32.vlgmr.msra.gmra.mrb[8].mxu1 %v864_v58  ;;  %v1582_v58 = vld [vmem:[%s3496_s3] sm:$0xff] }
 0x685   : > { %2722 = vmatpush3.bf16.msra.mxu1 %v3074_v7  ;;  %2482 = vmatprep.mubr.msk.f32.mxu1 %vm2946_vm0, %v2943_v0 }
 0x686   : > { %2723 = vmatprep.subr.bf16.mxu1 %v2944_v1 }
 0x689   : > { %2725 = vmatpush3.bf16.msra.mxu1 %v3083_v10 }
 0x68a   : > { %2726 = vmatprep.subr.bf16.mxu1 %v2944_v1 }
 0x68d   : > { %2728 = vmatpush3.bf16.msra.mxu1 %v3093_v13 }
 0x68e   : > { %2729 = vmatprep.subr.bf16.mxu1 %v2944_v1 }
 0x691   : > { %2731 = vmatpush3.bf16.msra.mxu1 %v3103_v16 }
 0x692   : > { %2732 = vmatprep.subr.bf16.mxu1 %v2944_v1 }
 0x695   : > { %2734 = vmatpush3.bf16.msra.mxu1 %v3135_v33 }
 0x696   : > { %2735 = vmatprep.subr.bf16.mxu1 %v2944_v1 }
 0x699   : > { %2737 = vmatpush3.bf16.msra.mxu1 %v3145_v36 }
 0x69a   : > { %2738 = vmatprep.subr.bf16.mxu1 %v2944_v1 }
 0x69d   : > { %2740 = vmatpush3.bf16.msra.mxu1 %v3155_v39 }
 0x69e   : > { %2741 = vmatprep.subr.bf16.mxu1 %v2944_v1 }
 0x6a1   : > { %2743 = vmatpush3.bf16.msra.mxu1 %v3164_v42 }
 0x6a2   : > { %2525 = vmatprep.subr.mxu1 %v2943_v0 }
 0x737   : > { %v1004_v59 = vpop.f32.mrb[6].mxu1 }
 0x738   : > { %v2400_v60 = vpop.f32.mrb[7].mxu1  ;;  %v1151_v63 = vmul.f32 %v1004_v59, %v1004_v59  ;;  %v1156_v8 = vrot.slane %v1004_v59, %v3227_v15 }
 0x73a   : > { %v1157_v11 = vsub.f32 %v3263_v40, %v1156_v8 }
 0x757   : > { %v1074_v61 = vpop.f32.mrb[8].mxu1 }
 0x758   : > { %v2435_v62 = vpop.f32.mrb[9].mxu1  ;;  %2439 = vmatmul.mubr.msk.f32.vlgmr.msra.gmra.mrb[8].mxu0 %vm521_vm4, %v1074_v61 }
 0x759   : > { %2447 = vmatprep.mubr.msk.f32.mxu0 %vm2946_vm0, %v2943_v0 }
 0x82b   : > { %v1147_v3 = vpop.f32.mrb[8].mxu0 }
 0x82c   : > { %v1152_v4 = vsub.f32 %v1147_v3, %v1151_v63  ;;  %v2440_v5 = vpop.f32.mrb[9].mxu0 }
 0x82e   : > { %v1158_v6 = vadd.f32 1e-05, %v1152_v4 }
 0x830   : > { %2865 = vrsqrt.f32 %v1158_v6 }
 0x83a   : > { %v2866_v9 = vpop.eup %2865 }
 0x83b   : > { %v1163_v12 = vrot.slane %v2866_v9, %v3227_v15 }
 0x83d   : > { %v1164_v18 = vmul.f32 %v1163_v12, %v1157_v11 }
 0x83f   : > { %v1165_v21 = vmul.f32 %v2075_v14, %v1164_v18 }
 0x841   : > { %v1166_v22 = vadd.f32 %v2076_v19, %v1165_v21 }
 0x843   : > { %v1167_v24 = vmax.f32 %v1166_v22, 0.0 }
 0x845   : > { %1177 = vrot.lane.b32.xlu1 %v1167_v24, %s2947_s13  ;;  %1176 = vst [vmem:[#allocation2 + $0x8] sm:$0xff] %v1167_v24  ;;  %1172 = vrot.lane.b32.xlu0 %v1167_v24, %s2945_s22  ;;  %s2094_s13 = sshll.u32 %s3017_s9, 7  ;;  %s2950_s9 = smov [#allocation3]  }
 0x846   : > { %s3451_s10 = scalar_lea.hbm %s3501_s8, %s2094_s13  ;;  %s2883_s17 = sshll.u32 %s2950_s9, 4  ;;  %s2884_s17 = int_to_ptr.vmem [resolvable:$false] %s2883_s17 }
 0x847   : > { %s2885_s19 = scalar_lea.vmem %s2884_s17, 256  ;;  %p2886_p0 = scmp.lt.s32.totalorder %s3453_s23, %s2884_s17 }
 0x848   : > { %p2887_p1 = scmp.lt.s32.totalorder %s2885_s19, %s2879_s18 }
 0x849   : > { %1587 = vperm.xlu1 %2861, %v2086_v25   ;;  %1186 = vperm.xlu0 %2862, %v2080_v26  }
 0x84a   : > { %p2888_p2 = por %p2887_p1, %p2886_p0 }
 0x84c   : > { %p2889_p3 = pnand %p2888_p2, %p2882_p13 }
 0x8b7   : > { %v1178_v17 = vpop.permute.xlu1 %1177  ;;  %v1173_v27 = vpop.permute.xlu0 %1172 }
 0x8b8   : > { %v1179_v28 = vsel %vm3115_vm2, %v1178_v17, 0.0  ;;  %v1174_v29 = vsel %vm3109_vm1, %v1173_v27, 0.0  ;;  %v2876_v30 = vpack.c.bf16 %v1167_v24, %v1173_v27 }
 0x8b9   : > { %1180 = vst [vmem:[#allocation2 + $0x10] sm:$0xff] %v1179_v28  ;;  %1175 = vst [vmem:[#allocation2] sm:$0xff] %v1174_v29 }
 0x8ba   : > { %2877 = vmatpush3.bf16.msk.msra.mxu0 %vm3245_vm6, %v2876_v30 }
 0x8bb   : > { %2445 = vmatprep.subr.mxu0 %v2943_v0 }
 0x8be   : > { %2878 = vmatpush3.msk.msra.mxu0 %vm3115_vm2, %v1178_v17 }
 0x8bf   : > { %2448 = vmatmul.mubr.msk.f32.vlgmr.msra.gmra.mrb[10].mxu0 %vm361_vm3, %v2079_v31  ;;  %2485 = vmatprep.subr.mxu0 %v2943_v0 }
 0x8c0   : > { %2486 = vmatpush3.msra.mxu0 %v3172_v43  ;;  %2487 = vmatprep.mubr.msk.f32.mxu0 %vm2946_vm0, %v2943_v0 }
 0x8c1   : > { %2744 = vmatprep.subr.bf16.mxu0 %v2944_v1 }
 0x8c8   : > { %v1187_v20 = vpop.permute.xlu0 %1186  ;;  %v1588_v63 = vpop.permute.xlu1 %1587 }
 0x992   : > { %v1258_v32 = vpop.f32.mrb[10].mxu0 }
 0x993   : > { %v3348_v34 = vadd.f32 %v1258_v32, %v1187_v20  ;;  %v2449_v35 = vpop.f32.mrb[11].mxu0 }
 0x994   : > { %v2083_v35 = vld [vmem:[%s3498_s5 + $0x28] sm:$0xff] }
 0x995   : > { %v1266_v37 = vrot.slane %v3348_v34, 4  ;;  %v1272_v47 = vmul.f32 %v3348_v34, %v3348_v34 }
 0x997   : > { %v1267_v23 = vadd.f32 %v1266_v37, %v3348_v34  ;;  %v1273_v48 = vrot.slane %v1272_v47, 4 }
 0x999   : > { %v1268_v38 = vrot.slane %v1267_v23, 2  ;;  %v1274_v49 = vadd.f32 %v1273_v48, %v1272_v47 }
 0x99b   : > { %v1269_v40 = vadd.f32 %v1268_v38, %v1267_v23  ;;  %v1275_v50 = vrot.slane %v1274_v49, 2  ;;  %v2089_v38 = vld [vmem:[%s3498_s5 + $0x30] sm:$0xff] }
 0x99d   : > { %v1270_v41 = vrot.slane %v1269_v40, 1  ;;  %v1276_v51 = vadd.f32 %v1275_v50, %v1274_v49 }
 0x99f   : > { %v1271_v44 = vadd.f32 %v1270_v41, %v1269_v40  ;;  %v1277_v52 = vrot.slane %v1276_v51, 1 }
 0x9a1   : > { %2483 = vmatmul.mubr.f32.vlgmr.msra.gmra.mrb[10].mxu1 %v1271_v44  ;;  %v1278_v53 = vadd.f32 %v1277_v52, %v1276_v51  ;;  %v2090_v44 = vld [vmem:[%s3498_s5 + $0x38] sm:$0xff] }
 0x9a2   : > { %2526 = vmatpush3.msra.mxu1 %v3172_v43  ;;  %2527 = vmatprep.mubr.msk.f32.mxu1 %vm2946_vm0, %v2943_v0 }
 0x9a3   : > { %2530 = vmatprep.subr.mxu1 %v2943_v0 }
 0xa74   : > { %v1345_v45 = vpop.f32.mrb[10].mxu1 }
 0xa75   : > { %v2484_v46 = vpop.f32.mrb[11].mxu1  ;;  %2488 = vmatmul.mubr.msk.f32.vlgmr.msra.gmra.mrb[12].mxu0 %vm521_vm4, %v1345_v45 }
 0xa76   : > { %2746 = vmatpush3.bf16.msra.mxu0 %v3074_v7  ;;  %2522 = vmatprep.mubr.msk.f32.mxu0 %vm2946_vm0, %v2943_v0 }
 0xa77   : > { %2747 = vmatprep.subr.bf16.mxu0 %v2944_v1 }
 0xa7a   : > { %2749 = vmatpush3.bf16.msra.mxu0 %v3083_v10 }
 0xa7b   : > { %2750 = vmatprep.subr.bf16.mxu0 %v2944_v1 }
 0xa7e   : > { %2752 = vmatpush3.bf16.msra.mxu0 %v3093_v13 }
 0xa7f   : > { %2753 = vmatprep.subr.bf16.mxu0 %v2944_v1 }
 0xa82   : > { %2755 = vmatpush3.bf16.msra.mxu0 %v3103_v16 }
 0xa83   : > { %2756 = vmatprep.subr.bf16.mxu0 %v2944_v1 }
 0xa86   : > { %2758 = vmatpush3.bf16.msra.mxu0 %v3135_v33 }
 0xa87   : > { %2759 = vmatprep.subr.bf16.mxu0 %v2944_v1 }
 0xa8a   : > { %2761 = vmatpush3.bf16.msra.mxu0 %v3145_v36 }
 0xa8b   : > { %2762 = vmatprep.subr.bf16.mxu0 %v2944_v1 }
 0xa8e   : > { %2764 = vmatpush3.bf16.msra.mxu0 %v3155_v39 }
 0xa8f   : > { %2765 = vmatprep.subr.bf16.mxu0 %v2944_v1 }
 0xa92   : > { %2767 = vmatpush3.bf16.msra.mxu0 %v3164_v42 }
 0xa93   : > { %2570 = vmatprep.subr.mxu0 %v2943_v0 }
 0xa95   : > { %2523 = vmatmul.mubr.f32.vlgmr.msra.gmra.mrb[14].mxu0 %v1278_v53 }
 0xa96   : > { %2571 = vmatpush3.msra.mxu0 %v3172_v43  ;;  %2572 = vmatprep.mubr.msk.f32.mxu0 %vm2946_vm0, %v2943_v0 }
 0xa97   : > { %2792 = vmatprep.subr.bf16.mxu0 %v2944_v1 }
 0xb48   : > { %v1418_v54 = vpop.f32.mrb[12].mxu0 }
 0xb49   : > { %v2489_v55 = vpop.f32.mrb[13].mxu0  ;;  %v1570_v11 = vrot.slane %v1418_v54, %v3227_v15 }
 0xb4b   : > { %v1571_v19 = vsub.f32 %v3348_v34, %v1570_v11 }
 0xb68   : > { %v1488_v56 = vpop.f32.mrb[14].mxu0 }
 0xb69   : > { %v2524_v57 = vpop.f32.mrb[15].mxu0  ;;  %2528 = vmatmul.mubr.msk.f32.vlgmr.msra.gmra.mrb[12].mxu1 %vm521_vm4, %v1488_v56 }
 0xb6a   : > { %2531 = vmatpush3.msk.msra.mxu1 %vm1594_vm7, %v3054_v2  ;;  %2532 = vmatprep.mubr.msk.f32.mxu1 %vm2946_vm0, %v2943_v0  ;;  %v1565_v2 = vmul.f32 %v1418_v54, %v1418_v54 }
 0xb6b   : > { %2768 = vmatprep.subr.bf16.mxu1 %v2944_v1 }
 0xb6d   : > { %2533 = vmatmul.mubr.msk.f32.vlgmr.msra.gmra.mrb[14].mxu1 %vm1590_vm8, %v1582_v58 }
 0xb6e   : > { %2770 = vmatpush3.bf16.msra.mxu1 %v3074_v7  ;;  %2567 = vmatprep.mubr.msk.f32.mxu1 %vm2946_vm0, %v2943_v0 }
 0xb6f   : > { %2771 = vmatprep.subr.bf16.mxu1 %v2944_v1 }
 0xb72   : > { %2773 = vmatpush3.bf16.msra.mxu1 %v3083_v10 }
 0xb73   : > { %2774 = vmatprep.subr.bf16.mxu1 %v2944_v1 }
 0xb76   : > { %2776 = vmatpush3.bf16.msra.mxu1 %v3093_v13 }
 0xb77   : > { %2777 = vmatprep.subr.bf16.mxu1 %v2944_v1 }
 0xb7a   : > { %2779 = vmatpush3.bf16.msra.mxu1 %v3103_v16 }
 0xb7b   : > { %2780 = vmatprep.subr.bf16.mxu1 %v2944_v1 }
 0xb7e   : > { %2782 = vmatpush3.bf16.msra.mxu1 %v3135_v33 }
 0xb7f   : > { %2783 = vmatprep.subr.bf16.mxu1 %v2944_v1 }
 0xb82   : > { %2785 = vmatpush3.bf16.msra.mxu1 %v3145_v36 }
 0xb83   : > { %2786 = vmatprep.subr.bf16.mxu1 %v2944_v1 }
 0xb86   : > { %2788 = vmatpush3.bf16.msra.mxu1 %v3155_v39 }
 0xb87   : > { %2789 = vmatprep.subr.bf16.mxu1 %v2944_v1 }
 0xb8a   : > { %2791 = vmatpush3.bf16.msra.mxu1 %v3164_v42 }
 0xb8b   : > { %2610 = vmatprep.subr.mxu1 %v2943_v0 }
 0xc3c   : > { %v1561_v59 = vpop.f32.mrb[12].mxu1 }
 0xc3d   : > { %v1566_v60 = vsub.f32 %v1561_v59, %v1565_v2  ;;  %v2529_v61 = vpop.f32.mrb[13].mxu1 }
 0xc3f   : > { %v1572_v62 = vadd.f32 1e-05, %v1566_v60 }
 0xc40   : > { %v1664_v3 = vpop.f32.mrb[14].mxu1 }
 0xc41   : > { %2867 = vrsqrt.f32 %v1572_v62  ;;  %v1665_v4 = vadd.f32 %v1664_v3, %v1588_v63  ;;  %v2534_v5 = vpop.f32.mrb[15].mxu1 }
 0xc43   : > { %v1672_v6 = vrot.slane %v1665_v4, 4  ;;  %v1678_v17 = vmul.f32 %v1665_v4, %v1665_v4 }
 0xc45   : > { %v1673_v8 = vadd.f32 %v1672_v6, %v1665_v4 }
 0xc47   : > { %v1674_v9 = vrot.slane %v1673_v8, 2 }
 0xc49   : > { %v1675_v12 = vadd.f32 %v1674_v9, %v1673_v8 }
 0xc4b   : > { %v2868_v14 = vpop.eup %2867  ;;  %v1676_v18 = vrot.slane %v1675_v12, 1 }
 0xc4c   : > { %v1577_v21 = vrot.slane %v2868_v14, %v3227_v15 }
 0xc4d   : > { %v1677_v22 = vadd.f32 %v1676_v18, %v1675_v12 }
 0xc4e   : > { %v1578_v24 = vmul.f32 %v1577_v21, %v1571_v19 }
 0xc4f   : > { %2568 = vmatmul.mubr.f32.vlgmr.msra.gmra.mrb[16].mxu1 %v1677_v22 }
 0xc50   : > { %2611 = vmatpush3.msra.mxu1 %v3172_v43  ;;  %2612 = vmatprep.mubr.msk.f32.mxu1 %vm2946_vm0, %v2943_v0  ;;  %v1679_v43 = vrot.slane %v1678_v17, 4 }
 0xc52   : > { %v1680_v27 = vadd.f32 %v1679_v43, %v1678_v17 }
 0xd22   : > { %v1751_v25 = vpop.f32.mrb[16].mxu1 }
 0xd23   : > { %v2569_v26 = vpop.f32.mrb[17].mxu1  ;;  %2573 = vmatmul.mubr.msk.f32.vlgmr.msra.gmra.mrb[16].mxu0 %vm521_vm4, %v1751_v25 }
 0xd24   : > { %2794 = vmatpush3.bf16.msra.mxu0 %v3074_v7  ;;  %2607 = vmatprep.mubr.msk.f32.mxu0 %vm2946_vm0, %v2943_v0  ;;  %v1681_v0 = vrot.slane %v1680_v27, 2 }
 0xd25   : > { %2795 = vmatprep.subr.bf16.mxu0 %v2944_v1 }
 0xd26   : > { %v1682_v7 = vadd.f32 %v1681_v0, %v1680_v27 }
 0xd28   : > { %2797 = vmatpush3.bf16.msra.mxu0 %v3083_v10  ;;  %v1683_v10 = vrot.slane %v1682_v7, 1 }
 0xd29   : > { %2798 = vmatprep.subr.bf16.mxu0 %v2944_v1 }
 0xd2c   : > { %2800 = vmatpush3.bf16.msra.mxu0 %v3093_v13  ;;  %v1684_v13 = vadd.f32 %v1683_v10, %v1682_v7 }
 0xd2d   : > { %2801 = vmatprep.subr.bf16.mxu0 %v2944_v1 }
 0xd30   : > { %2803 = vmatpush3.bf16.msra.mxu0 %v3103_v16 }
 0xd31   : > { %2804 = vmatprep.subr.bf16.mxu0 %v2944_v1 }
 0xd34   : > { %2806 = vmatpush3.bf16.msra.mxu0 %v3135_v33 }
 0xd35   : > { %2807 = vmatprep.subr.bf16.mxu0 %v2944_v1 }
 0xd38   : > { %2809 = vmatpush3.bf16.msra.mxu0 %v3145_v36 }
 0xd39   : > { %2810 = vmatprep.subr.bf16.mxu0 %v2944_v1 }
 0xd3c   : > { %2812 = vmatpush3.bf16.msra.mxu0 %v3155_v39 }
 0xd3d   : > { %2813 = vmatprep.subr.bf16.mxu0 %v2944_v1  ;;  %v2082_v1 = vld [vmem:[%s3498_s5 + $0x20] sm:$0xff] }
 0xd40   : > { %2815 = vmatpush3.bf16.msra.mxu0 %v3164_v42  ;;  %v1579_v42 = vmul.f32 %v2082_v1, %v1578_v24 }
 0xd42   : > { %v1580_v40 = vadd.f32 %v2083_v35, %v1579_v42 }
 0xd43   : > { %2608 = vmatmul.mubr.f32.vlgmr.msra.gmra.mrb[18].mxu0 %v1684_v13 }
 0xd44   : > { %v1581_v46 = vmax.f32 %v1580_v40, 0.0 }
 0xdf6   : > { %v1824_v16 = vpop.f32.mrb[16].mxu0 }
 0xdf7   : > { %v2574_v33 = vpop.f32.mrb[17].mxu0  ;;  %v1971_v36 = vmul.f32 %v1824_v16, %v1824_v16  ;;  %v1976_v39 = vrot.slane %v1824_v16, %v3227_v15 }
 0xdf9   : > { %v1977_v37 = vsub.f32 %v1665_v4, %v1976_v39 }
 0xe16   : > { %v1894_v28 = vpop.f32.mrb[18].mxu0 }
 0xe17   : > { %v2609_v29 = vpop.f32.mrb[19].mxu0  ;;  %2613 = vmatmul.mubr.msk.f32.vlgmr.msra.gmra.mrb[18].mxu1 %vm521_vm4, %v1894_v28 }
 0xeea   : > { %v1967_v30 = vpop.f32.mrb[18].mxu1 }
 0xeeb   : > { %v1972_v31 = vsub.f32 %v1967_v30, %v1971_v36  ;;  %v2614_v20 = vpop.f32.mrb[19].mxu1 }
 0xeed   : > { %v1978_v32 = vadd.f32 1e-05, %v1972_v31 }
 0xeef   : > { %2869 = vrsqrt.f32 %v1978_v32 }
 0xef9   : > { %v2870_v34 = vpop.eup %2869 }
 0xefa   : > { %v1983_v23 = vrot.slane %v2870_v34, %v3227_v15 }
 0xefc   : > { %v1984_v41 = vmul.f32 %v1983_v23, %v1977_v37 }
 0xefe   : > { %v1985_v45 = vmul.f32 %v2089_v38, %v1984_v41 }
 0xf00   : > { %v1986_v47 = vadd.f32 %v2090_v44, %v1985_v45 }
 0xf02   : > { %v1987_v48 = vadd.f32 %v1986_v47, %v1581_v46 }
 0xf04   : > { %v1988_v15 = vmax.f32 %v1987_v48, 0.0 }
 0xf06   : > { %1989 = vst [vmem:[%s296_s21] sm:$0xff] %v1988_v15 }
 0xf07   : > { %2892 = shalt.err (!%p2889_p3)
}
 0xf08   : > { %s2893_s26 = scalar_lea.hbm %s3451_s10, 128  ;;  %s2897_s13 = scalar_lea.hbm %s3501_s8, 256 }
 0xf09   : > { %p2894_p4 = scmp.ne.s32.totalorder %s3451_s10, %s2893_s26  ;;  %p2898_p9 = scmp.lt.u32.totalorder %s3451_s10, %s3501_s8 }
 0xf0a   : > { %p2899_p10 = scmp.lt.u32.totalorder %s2897_s13, %s2893_s26  ;;  %p2901_p12 = scmp.lt.u32.totalorder %s2893_s26, %s3451_s10 }
 0xf0b   : > { %p2895_p7 = pnand %p2894_p4, %p3034_p5 }
 0xf0c   : > { %p2900_p11 = por %p2899_p10, %p2898_p9 }
 0xf0d   : > { %p2896_p8 = pneg %p2895_p7 }
 0xf0e   : > { %p2902_p13 = por %p2901_p12, %p2900_p11 }
 0xf10   : > { %p2903_p0 = pnand %p2902_p13, %p2896_p8 }
 0xf12   : > { %2906 = shalt.err (!%p2903_p0)
}
 0xf13   : > { %2816 = dma.vmem_to_hbm [thread:$0]  (%p3034_p5), %s3453_s23, 128, %s3451_s10, %s1991_s12  }
 0xf14 PF: > { %p2822_p1 = scmp.ge.s32.totalorder %s2941_s30, 2  ;;  %s2016_s25 = sand.u32 1, %s2929_s27  }
 0xf15   : > { %s2017_s18 = scalar_lea.sflag [#allocation4], %s2016_s25 }
 0xf16   : > { %p2819_p2 = pnand %p2822_p1, %p3038_p6 }
 0xf18   : > { %2924 = dma.done.wait (!%p2819_p2), %s2017_s18, 128  }
 0xf19   : > { %2926 = vsyncadd (!%p2819_p2), %s2017_s18, 4294967168  ;;  %p18_p3 = scmp.ge.s32.totalorder %s3021_s11, 4   ;;  %s3510_s27 = smov %s2933_s28 }
 0xf1a   : > { %s3511_s28 = smov %s2937_s29  ;;  %s3512_s29 = smov %s3032_s14 }
 0xf1b   : > { %s3513_s30 = smov %s3021_s11  ;;  %20 = sbr.rel (!%p18_p3) target bundleno = 3 (0x3), region = 98 }
 0xf22   :  { %2022 = vsyncpa [#allocation4], 1 }
 0xf23   :  { %2024 = vsyncpa [#allocation4 + $0x1], 1 }

</bundles_post_ra>
